<compile_context>
chip_gen: v6e
topology: v6e:2x2x1
jax: 0.10.0
libtpu: 0.0.40
codegen_flags: <defaults>
</compile_context>

<pallas_src>
import functools
import math

import jax
import jax.numpy as jnp
from jax.experimental import pallas as pl
from jax.experimental.pallas import tpu as pltpu


# ----------------------------- helpers ------------------------------------- #

def _round_up(x, m):
    return (x + m - 1) // m * m


def _gelu(x):
    # TODO(synk): PyTorch nn.GELU() defaults to the exact erf form; the tanh
    # approximation is used because erf is not guaranteed to lower in Mosaic.
    c = math.sqrt(2.0 / math.pi)
    return 0.5 * x * (1.0 + jnp.tanh(c * (x + 0.044715 * x * x * x)))


def _layernorm_padded(z, w, b, d_real, d_extra, eps=1e-5):
    # z: (T, D_pad) f32 whose padded feature columns are exactly zero; w/b are
    # zero-padded so the padded columns of the output stay zero. The padded columns
    # contribute mu^2 each to sum(d*d); subtract analytically instead of masking.
    inv_n = 1.0 / float(d_real)
    mu = jnp.sum(z, axis=-1, keepdims=True) * inv_n
    d = z - mu
    ss = jnp.sum(d * d, axis=-1, keepdims=True) - float(d_extra) * (mu * mu)
    var = jnp.maximum(ss, 0.0) * inv_n
    return d * jax.lax.rsqrt(var + eps) * w + b


# ----------------------------- fused kernel --------------------------------- #

def vit_fused_kernel(patches_ref, w_proj_ref, add_ref, kbias_ref,
                     wqkv_ref, w0_ref, ln1w_ref, ln1b_ref,
                     wff1_ref, bff1_ref, wff2_ref, bff2_ref,
                     ln2w_ref, ln2b_ref, wh_ref, bh_ref,
                     logits_ref,
                     act_ref, hbuf_ref,
                     *, heads, dim_head, d_real, cls_row, tokens_pad):
    # grid = (batch, block). The activation lives in act_ref (VMEM scratch) across the
    # block axis; the only HBM output is the (1, 1, nc_pad) logits block per batch.
    l = pl.program_id(1)
    n_blocks = pl.num_programs(1)
    Tp, D_pad = act_ref.shape
    d_heads = heads * dim_head
    d_extra = D_pad - d_real

    # ---- fused patch embedding (block 0 only): projection + pos/cls rows ----
    @pl.when(l == 0)
    def _():
        proj = jnp.dot(patches_ref[0], w_proj_ref[...],
                       preferred_element_type=jnp.float32)          # (tokens_pad, D_pad)
        act_ref[0:tokens_pad, :] = proj + add_ref[0:tokens_pad, :]
        act_ref[tokens_pad:Tp, :] = add_ref[tokens_pad:Tp, :]       # cls row + pad rows

    x = act_ref[...]                                  # (Tp, D_pad) f32, VMEM resident

    # ---- MHSA: fused lane-dense QKV projection (scale pre-folded into Q cols) ----
    qkv = jnp.dot(x.astype(jnp.bfloat16), wqkv_ref[0],
                  preferred_element_type=jnp.float32)                # (Tp, 3*d_heads)
    qkv = qkv.astype(jnp.bfloat16)
    key_bias = kbias_ref[...]                         # (1, Tp) f32, precomputed mask

    for h in range(heads):                            # unrolled; heads is small
        q = qkv[:, h * dim_head:(h + 1) * dim_head]
        k = qkv[:, d_heads + h * dim_head: d_heads + (h + 1) * dim_head]
        v = qkv[:, 2 * d_heads + h * dim_head: 2 * d_heads + (h + 1) * dim_head]
        s = jax.lax.dot_general(q, k, (((1,), (1,)), ((), ())),
                                preferred_element_type=jnp.float32)  # (Tp, Tp)
        s = s + key_bias
        s = s - jnp.max(s, axis=-1, keepdims=True)
        e = jnp.exp(s)
        attn = e * pl.reciprocal(jnp.sum(e, axis=-1, keepdims=True), approx=True)
        # per-head write into the scratch at a static lane offset (no lane concat)
        hbuf_ref[:, h * dim_head:(h + 1) * dim_head] = jnp.dot(
            attn.astype(jnp.bfloat16), v, preferred_element_type=jnp.float32)

    attn_out = jnp.dot(hbuf_ref[...].astype(jnp.bfloat16), w0_ref[0],
                       preferred_element_type=jnp.float32)           # (Tp, D_pad)

    # ---- post-norm transformer block (f32 LN / residuals) ----
    y = _layernorm_padded(attn_out + x, ln1w_ref[0], ln1b_ref[0], d_real, d_extra)
    h1 = jnp.dot(y.astype(jnp.bfloat16), wff1_ref[0],
                 preferred_element_type=jnp.float32) + bff1_ref[0]
    h2 = jnp.dot(_gelu(h1).astype(jnp.bfloat16), wff2_ref[0],
                 preferred_element_type=jnp.float32) + bff2_ref[0]
    out = _layernorm_padded(h2 + y, ln2w_ref[0], ln2b_ref[0], d_real, d_extra)
    act_ref[...] = out

    # ---- fused classification head (last block only): mlp_head(y[cls]) ----
    @pl.when(l == n_blocks - 1)
    def _():
        cls = out[cls_row:cls_row + 1, :].astype(jnp.bfloat16)       # (1, D_pad)
        logits_ref[0] = jnp.dot(cls, wh_ref[...],
                                preferred_element_type=jnp.float32) + bh_ref[...]


# ----------------------------- parameters ---------------------------------- #

def init_vit_params(key, *, img_dim, in_channels, patch_dim, num_classes, dim,
                    blocks, heads, dim_linear_block):
    """PyTorch-layout parameters (mirrors the nn.Module)."""
    padded_dim = (img_dim + patch_dim - 1) // patch_dim * patch_dim
    tokens = (padded_dim // patch_dim) ** 2
    token_dim = in_channels * patch_dim ** 2
    dim_head = dim // heads
    _dim = dim_head * heads

    keys = iter(jax.random.split(key, 6 + 6 * blocks))

    def nrm(shape, scale=0.02):
        return scale * jax.random.normal(next(keys), shape, jnp.float32)

    params = dict(
        patch_dim=patch_dim, padded_dim=padded_dim, tokens=tokens,
        token_dim=token_dim, dim=dim, heads=heads, dim_head=dim_head,
        dim_linear_block=dim_linear_block, num_classes=num_classes,
        w_proj=nrm((dim, token_dim)),            # nn.Linear(token_dim, dim)
        b_proj=nrm((dim,)),
        cls_token=nrm((1, dim), scale=1.0),      # nn.Parameter randn(1,1,dim)
        pos_emb=nrm((tokens + 1, dim), scale=1.0),
        w_head=nrm((num_classes, dim)),          # nn.Linear(dim, num_classes)
        b_head=nrm((num_classes,)),
        blocks=[],
    )
    for _ in range(blocks):
        params["blocks"].append(dict(
            w_qkv=nrm((3 * _dim, dim)),          # to_qvk (bias=False)
            w_0=nrm((dim, _dim)),                # W_0 (bias=False)
            ln1_w=jnp.ones((dim,), jnp.float32),
            ln1_b=jnp.zeros((dim,), jnp.float32),
            w_ff1=nrm((dim_linear_block, dim)),
            b_ff1=nrm((dim_linear_block,)),
            w_ff2=nrm((dim, dim_linear_block)),
            b_ff2=nrm((dim,)),
            ln2_w=jnp.ones((dim,), jnp.float32),
            ln2_b=jnp.zeros((dim,), jnp.float32),
        ))
    return params


def pack_vit_params(params):
    """One-time pack: transpose / fuse / zero-pad / stack into matmul-ready layouts."""
    D = params["dim"]
    heads = params["heads"]
    dh = params["dim_head"]
    dff = params["dim_linear_block"]
    tokens = params["tokens"]
    token_dim = params["token_dim"]
    nc = params["num_classes"]
    d_heads = heads * dh
    blocks = params["blocks"]

    D_pad = _round_up(D, 128)              # lane-dense feature dim
    dff_pad = _round_up(dff, 128)          # lane-dense FFN dim
    nc_pad = _round_up(nc, 128)            # lane-dense head output
    tokens_pad = _round_up(tokens, 8)      # patch slab alignment (no host copy if aligned)
    cls_row = tokens_pad                   # cls token placed AFTER the patch tokens
    Tp = _round_up(tokens_pad + 1, 16)     # bf16-friendly total padded sequence
    scale = float(dh) ** -0.5

    def pad2(w, r, c):
        out = jnp.zeros((r, c), w.dtype)
        return out.at[:w.shape[0], :w.shape[1]].set(w)

    def padrow(v, c):
        out = jnp.zeros((1, c), v.dtype)
        return out.at[0, :v.shape[0]].set(v)

    def qkv_fused(w):
        # to_qvk weight rows follow einops '(d k h)': r = d*(3*heads) + k*heads + h.
        # Fuse to (D, 3*H*dh) with col = k*H*dh + h*dh + d so Q/K/V per head are
        # contiguous lane ranges; fold the attention scale into the Q (k=0) columns.
        f = (w.reshape(dh, 3, heads, D).transpose(1, 2, 0, 3)
              .reshape(3 * d_heads, D).T)                            # (D, 3*d_heads)
        f = f.at[:, :d_heads].multiply(scale)
        return pad2(f, D_pad, 3 * d_heads)

    # add_rows: [bias+pos for patch tokens ; zeros ; cls+pos0 ; zeros]
    add_rows = jnp.zeros((Tp, D_pad), jnp.float32)
    add_rows = add_rows.at[:tokens, :D].set(params["b_proj"][None, :]
                                            + params["pos_emb"][1:tokens + 1])
    add_rows = add_rows.at[cls_row, :D].set(params["cls_token"][0] + params["pos_emb"][0])

    # precomputed additive key mask row: 0 for real tokens + cls, -1e30 for pad rows
    key_bias = jnp.full((1, Tp), -1e30, jnp.float32)
    key_bias = key_bias.at[0, :tokens].set(0.0)
    key_bias = key_bias.at[0, cls_row].set(0.0)

    return dict(
        # static config
        patch_dim=params["patch_dim"], padded_dim=params["padded_dim"],
        tokens=tokens, token_dim=token_dim, dim=D, dim_pad=D_pad,
        heads=heads, dim_head=dh, d_heads=d_heads,
        dim_linear_block=dff, dff_pad=dff_pad, num_classes=nc, nc_pad=nc_pad,
        num_blocks=len(blocks), tokens_pad=tokens_pad, cls_row=cls_row, seq_pad=Tp,
        # patch embedding (fused into the transformer call)
        w_proj=pad2(params["w_proj"].T, token_dim, D_pad).astype(jnp.bfloat16),
        add_rows=add_rows,                                           # (Tp, D_pad) f32
        key_bias=key_bias,                                           # (1, Tp) f32
        # transformer blocks, stacked along the block axis
        w_qkv=jnp.stack([qkv_fused(b["w_qkv"]) for b in blocks]).astype(jnp.bfloat16),
        w_0=jnp.stack([pad2(b["w_0"].T, d_heads, D_pad)
                       for b in blocks]).astype(jnp.bfloat16),
        ln1_w=jnp.stack([padrow(b["ln1_w"], D_pad) for b in blocks]),
        ln1_b=jnp.stack([padrow(b["ln1_b"], D_pad) for b in blocks]),
        w_ff1=jnp.stack([pad2(b["w_ff1"].T, D_pad, dff_pad)
                         for b in blocks]).astype(jnp.bfloat16),
        b_ff1=jnp.stack([padrow(b["b_ff1"], dff_pad) for b in blocks]),
        w_ff2=jnp.stack([pad2(b["w_ff2"].T, dff_pad, D_pad)
                         for b in blocks]).astype(jnp.bfloat16),
        b_ff2=jnp.stack([padrow(b["b_ff2"], D_pad) for b in blocks]),
        ln2_w=jnp.stack([padrow(b["ln2_w"], D_pad) for b in blocks]),
        ln2_b=jnp.stack([padrow(b["ln2_b"], D_pad) for b in blocks]),
        # classification head (lane-padded), fused into the last block step
        w_head=pad2(params["w_head"].T, D_pad, nc_pad).astype(jnp.bfloat16),
        b_head=padrow(params["b_head"], nc_pad),
    )


# ----------------------------- forward -------------------------------------- #

def vit_forward(img, pk):
    B, C, H, W = img.shape
    p = pk["patch_dim"]
    P = pk["padded_dim"]
    D = pk["dim"]
    D_pad = pk["dim_pad"]
    tokens = pk["tokens"]
    tokens_pad = pk["tokens_pad"]
    token_dim = pk["token_dim"]
    heads = pk["heads"]
    dh = pk["dim_head"]
    d_heads = pk["d_heads"]
    dff_pad = pk["dff_pad"]
    nc = pk["num_classes"]
    nc_pad = pk["nc_pad"]
    L = pk["num_blocks"]
    Tp = pk["seq_pad"]
    cls_row = pk["cls_row"]

    # F.pad + einops 'b c (px x) (py y) -> b (x y) (px py c)'  -- plain-JAX glue
    img = jnp.pad(img, ((0, 0), (0, 0), (0, P - H), (0, P - W)))
    X = P // p
    patches = (img.reshape(B, C, p, X, p, X)
                  .transpose(0, 3, 5, 2, 4, 1)
                  .reshape(B, tokens, token_dim)).astype(jnp.bfloat16)
    if tokens_pad != tokens:
        patches = jnp.pad(patches, ((0, 0), (0, tokens_pad - tokens), (0, 0)))

    # ---- VMEM budget: double-buffered per-block weights + resident tensors ----
    per_block_w = (D_pad * 3 * d_heads * 2 + d_heads * D_pad * 2
                   + 4 * D_pad * 4 + D_pad * dff_pad * 2 + dff_pad * 4
                   + dff_pad * D_pad * 2 + D_pad * 4)
    resident = (tokens_pad * token_dim * 2 + token_dim * D_pad * 2
                + Tp * D_pad * 4 + Tp * 4 + D_pad * nc_pad * 2 + nc_pad * 4
                + Tp * D_pad * 4 + Tp * d_heads * 4 + nc_pad * 4)
    needed = 2 * per_block_w + 2 * resident + (4 << 20)
    try:
        vmem_cap = int(pltpu.get_tpu_info().vmem_capacity_bytes)
    except Exception:
        vmem_cap = 64 << 20                       # conservative (v7x physical size)
    vmem_budget = int(min(max(needed, 32 << 20), int(vmem_cap * 0.75)))

    kern = functools.partial(vit_fused_kernel, heads=heads, dim_head=dh,
                             d_real=D, cls_row=cls_row, tokens_pad=tokens_pad)

    def _wspec(shape):      # stacked per-block weights, indexed by the block axis
        return pl.BlockSpec((1,) + shape, lambda b, l: (l, 0, 0))

    def _cspec(shape):      # constants shared across the whole grid
        nd = len(shape)
        return pl.BlockSpec(shape, lambda b, l: (0,) * nd)

    logits_pad = pl.pallas_call(
        kern,
        out_shape=jax.ShapeDtypeStruct((B, 1, nc_pad), jnp.float32),
        grid=(B, L),
        in_specs=[
            pl.BlockSpec((1, tokens_pad, token_dim), lambda b, l: (b, 0, 0)),
            _cspec((token_dim, D_pad)),
            _cspec((Tp, D_pad)),
            _cspec((1, Tp)),
            _wspec((D_pad, 3 * d_heads)),
            _wspec((d_heads, D_pad)),
            _wspec((1, D_pad)), _wspec((1, D_pad)),
            _wspec((D_pad, dff_pad)), _wspec((1, dff_pad)),
            _wspec((dff_pad, D_pad)), _wspec((1, D_pad)),
            _wspec((1, D_pad)), _wspec((1, D_pad)),
            _cspec((D_pad, nc_pad)),
            _cspec((1, nc_pad)),
        ],
        out_specs=pl.BlockSpec((1, 1, nc_pad), lambda b, l: (b, 0, 0)),
        scratch_shapes=[pltpu.VMEM((Tp, D_pad), jnp.float32),    # carried activation
                        pltpu.VMEM((Tp, d_heads), jnp.float32)], # per-head outputs
        compiler_params=pltpu.CompilerParams(
            dimension_semantics=("parallel", "arbitrary"),
            vmem_limit_bytes=vmem_budget),
    )(patches, pk["w_proj"], pk["add_rows"], pk["key_bias"],
      pk["w_qkv"], pk["w_0"], pk["ln1_w"], pk["ln1_b"],
      pk["w_ff1"], pk["b_ff1"], pk["w_ff2"], pk["b_ff2"],
      pk["ln2_w"], pk["ln2_b"], pk["w_head"], pk["b_head"])

    return logits_pad[:, 0, :nc]


# ----------------------------- main ----------------------------------------- #

if __name__ == "__main__":
    B, C, IMG, PATCH = 2, 4, 16, 4
    DIM, HEADS, BLOCKS, DFF, NUM_CLASSES = 32, 4, 2, 64, 10

    key = jax.random.PRNGKey(0)
    pkey, xkey = jax.random.split(key)
    params = init_vit_params(
        pkey, img_dim=IMG, in_channels=C, patch_dim=PATCH,
        num_classes=NUM_CLASSES, dim=DIM, blocks=BLOCKS,
        heads=HEADS, dim_linear_block=DFF)
    packed = pack_vit_params(params)

    img = jax.random.normal(xkey, (B, C, IMG, IMG), jnp.float32)

    logits = vit_forward(img, packed)
    jax.block_until_ready(logits)
    assert logits.shape == (B, NUM_CLASSES)
    assert bool(jnp.all(jnp.isfinite(logits)))
    print("KERNEL_OK")
</pallas_src>

<mosaic_0001>
module attributes {stable_mosaic.version = 11 : i64} {
  func.func @vit_fused_kernel(%arg0: i32, %arg1: i32, %arg2: memref<1x16x64xbf16, #tpu.memory_space<vmem>>, %arg3: memref<64x128xbf16, #tpu.memory_space<vmem>>, %arg4: memref<32x128xf32, #tpu.memory_space<vmem>>, %arg5: memref<1x32xf32, #tpu.memory_space<vmem>>, %arg6: memref<1x128x96xbf16, #tpu.memory_space<vmem>>, %arg7: memref<1x32x128xbf16, #tpu.memory_space<vmem>>, %arg8: memref<1x1x128xf32, #tpu.memory_space<vmem>>, %arg9: memref<1x1x128xf32, #tpu.memory_space<vmem>>, %arg10: memref<1x128x128xbf16, #tpu.memory_space<vmem>>, %arg11: memref<1x1x128xf32, #tpu.memory_space<vmem>>, %arg12: memref<1x128x128xbf16, #tpu.memory_space<vmem>>, %arg13: memref<1x1x128xf32, #tpu.memory_space<vmem>>, %arg14: memref<1x1x128xf32, #tpu.memory_space<vmem>>, %arg15: memref<1x1x128xf32, #tpu.memory_space<vmem>>, %arg16: memref<128x128xbf16, #tpu.memory_space<vmem>>, %arg17: memref<1x128xf32, #tpu.memory_space<vmem>>, %arg18: memref<1x1x128xf32, #tpu.memory_space<vmem>>, %arg19: memref<32x128xf32, #tpu.memory_space<vmem>>, %arg20: memref<32x32xf32, #tpu.memory_space<vmem>>) attributes {dimension_semantics = [#tpu.dimension_semantics<parallel>, #tpu.dimension_semantics<arbitrary>], iteration_bounds = array<i64: 2, 2>, scalar_prefetch = 0 : i64, scratch_operands = 2 : i64, tpu.core_type = #tpu.core_type<tc>, window_params = [{transform_indices = @transform_0, window_bounds = array<i64: 1, 16, 64>}, {pipeline_mode = #tpu.pipeline_mode<synchronous>, transform_indices = @transform_1, window_bounds = array<i64: 64, 128>}, {pipeline_mode = #tpu.pipeline_mode<synchronous>, transform_indices = @transform_2, window_bounds = array<i64: 32, 128>}, {pipeline_mode = #tpu.pipeline_mode<synchronous>, transform_indices = @transform_3, window_bounds = array<i64: 1, 32>}, {transform_indices = @transform_4, window_bounds = array<i64: 1, 128, 96>}, {transform_indices = @transform_5, window_bounds = array<i64: 1, 32, 128>}, {transform_indices = @transform_6, window_bounds = array<i64: 1, 1, 128>}, {transform_indices = @transform_7, window_bounds = array<i64: 1, 1, 128>}, {transform_indices = @transform_8, window_bounds = array<i64: 1, 128, 128>}, {transform_indices = @transform_9, window_bounds = array<i64: 1, 1, 128>}, {transform_indices = @transform_10, window_bounds = array<i64: 1, 128, 128>}, {transform_indices = @transform_11, window_bounds = array<i64: 1, 1, 128>}, {transform_indices = @transform_12, window_bounds = array<i64: 1, 1, 128>}, {transform_indices = @transform_13, window_bounds = array<i64: 1, 1, 128>}, {pipeline_mode = #tpu.pipeline_mode<synchronous>, transform_indices = @transform_14, window_bounds = array<i64: 128, 128>}, {pipeline_mode = #tpu.pipeline_mode<synchronous>, transform_indices = @transform_15, window_bounds = array<i64: 1, 128>}, {transform_indices = @transform_16, window_bounds = array<i64: 1, 1, 128>}]} {
    %c0_i32 = arith.constant 0 : i32
    %0 = arith.cmpi eq, %arg1, %c0_i32 : i32
    %1 = arith.extui %0 : i1 to i32
    %c0_i32_0 = arith.constant 0 : i32
    %2 = arith.cmpi ne, %1, %c0_i32_0 : i32
    scf.if %2 {
      %c0_81 = arith.constant 0 : index
      %c0_82 = arith.constant 0 : index
      %c0_83 = arith.constant 0 : index
      %186 = vector.load %arg2[%c0_81, %c0_82, %c0_83] : memref<1x16x64xbf16, #tpu.memory_space<vmem>>, vector<1x16x64xbf16>
      %187 = vector.shape_cast %186 : vector<1x16x64xbf16> to vector<16x64xbf16>
      %c0_84 = arith.constant 0 : index
      %c0_85 = arith.constant 0 : index
      %188 = vector.load %arg3[%c0_84, %c0_85] : memref<64x128xbf16, #tpu.memory_space<vmem>>, vector<64x128xbf16>
      %cst_86 = arith.constant dense<0.000000e+00> : vector<16x128xf32>
      %189 = tpu.matmul %187, %188, %cst_86 {dimension_numbers = #tpu.dot_dimension_numbers<[1], [0], [0], [1], [0, 0, 1, 1], [], []>} : vector<16x64xbf16>, vector<64x128xbf16>, vector<16x128xf32> -> vector<16x128xf32>
      %c0_87 = arith.constant 0 : index
      %c0_88 = arith.constant 0 : index
      %190 = vector.load %arg4[%c0_87, %c0_88] : memref<32x128xf32, #tpu.memory_space<vmem>>, vector<16x128xf32>
      %191 = arith.addf %189, %190 : vector<16x128xf32>
      %c0_89 = arith.constant 0 : index
      %c0_90 = arith.constant 0 : index
      %192 = vector.load %arg19[%c0_89, %c0_90] : memref<32x128xf32, #tpu.memory_space<vmem>>, vector<16x128xf32>
      tpu.vector_store %arg19[%c0_89, %c0_90], %191 {strides = array<i32>} : memref<32x128xf32, #tpu.memory_space<vmem>>, vector<16x128xf32>,
      %c16_91 = arith.constant 16 : index
      %c0_92 = arith.constant 0 : index
      %193 = vector.load %arg4[%c16_91, %c0_92] : memref<32x128xf32, #tpu.memory_space<vmem>>, vector<16x128xf32>
      %c16_93 = arith.constant 16 : index
      %c0_94 = arith.constant 0 : index
      %194 = vector.load %arg19[%c16_93, %c0_94] : memref<32x128xf32, #tpu.memory_space<vmem>>, vector<16x128xf32>
      tpu.vector_store %arg19[%c16_93, %c0_94], %193 {strides = array<i32>} : memref<32x128xf32, #tpu.memory_space<vmem>>, vector<16x128xf32>,
    } else {
    }
    %c0 = arith.constant 0 : index
    %c0_1 = arith.constant 0 : index
    %3 = vector.load %arg19[%c0, %c0_1] : memref<32x128xf32, #tpu.memory_space<vmem>>, vector<32x128xf32>
    %4 = arith.truncf %3 : vector<32x128xf32> to vector<32x128xbf16>
    %c0_2 = arith.constant 0 : index
    %c0_3 = arith.constant 0 : index
    %c0_4 = arith.constant 0 : index
    %5 = vector.load %arg6[%c0_2, %c0_3, %c0_4] : memref<1x128x96xbf16, #tpu.memory_space<vmem>>, vector<1x128x96xbf16>
    %6 = vector.shape_cast %5 : vector<1x128x96xbf16> to vector<128x96xbf16>
    %cst = arith.constant dense<0.000000e+00> : vector<32x96xf32>
    %7 = tpu.matmul %4, %6, %cst {dimension_numbers = #tpu.dot_dimension_numbers<[1], [0], [0], [1], [0, 0, 1, 1], [], []>} : vector<32x128xbf16>, vector<128x96xbf16>, vector<32x96xf32> -> vector<32x96xf32>
    %8 = arith.truncf %7 : vector<32x96xf32> to vector<32x96xbf16>
    %c0_5 = arith.constant 0 : index
    %c0_6 = arith.constant 0 : index
    %9 = vector.load %arg5[%c0_5, %c0_6] : memref<1x32xf32, #tpu.memory_space<vmem>>, vector<1x32xf32>
    %10 = vector.extract_strided_slice %8 {offsets = [0, 0], sizes = [32, 8], strides = [1, 1]} : vector<32x96xbf16> to vector<32x8xbf16>
    %11 = vector.extract_strided_slice %8 {offsets = [0, 32], sizes = [32, 8], strides = [1, 1]} : vector<32x96xbf16> to vector<32x8xbf16>
    %12 = vector.extract_strided_slice %8 {offsets = [0, 64], sizes = [32, 8], strides = [1, 1]} : vector<32x96xbf16> to vector<32x8xbf16>
    %cst_7 = arith.constant dense<0.000000e+00> : vector<32x32xf32>
    %13 = tpu.matmul %10, %11, %cst_7 {dimension_numbers = #tpu.dot_dimension_numbers<[1], [1], [0], [0], [0, 0, 1, 0], [], []>} : vector<32x8xbf16>, vector<32x8xbf16>, vector<32x32xf32> -> vector<32x32xf32>
    %14 = vector.broadcast %9 : vector<1x32xf32> to vector<32x32xf32>
    %15 = arith.addf %13, %14 : vector<32x32xf32>
    %cst_8 = arith.constant dense<0xFF800000> : vector<32xf32>
    %16 = vector.multi_reduction <maximumf>, %15, %cst_8 [1] : vector<32x32xf32> to vector<32xf32>
    %17 = vector.shape_cast %16 : vector<32xf32> to vector<32x1xf32>
    %18 = vector.broadcast %17 : vector<32x1xf32> to vector<32x32xf32>
    %19 = arith.subf %15, %18 : vector<32x32xf32>
    %20 = math.exp %19 : vector<32x32xf32>
    %cst_9 = arith.constant dense<0.000000e+00> : vector<32xf32>
    %21 = vector.multi_reduction <add>, %20, %cst_9 [1] : vector<32x32xf32> to vector<32xf32>
    %22 = vector.shape_cast %21 : vector<32xf32> to vector<32x1xf32>
    %23 = tpu.reciprocal %22 {approx = true} : vector<32x1xf32> -> vector<32x1xf32>
    %24 = vector.broadcast %23 : vector<32x1xf32> to vector<32x32xf32>
    %25 = arith.mulf %20, %24 : vector<32x32xf32>
    %26 = arith.truncf %25 : vector<32x32xf32> to vector<32x32xbf16>
    %cst_10 = arith.constant dense<0.000000e+00> : vector<32x8xf32>
    %27 = tpu.matmul %26, %12, %cst_10 {dimension_numbers = #tpu.dot_dimension_numbers<[1], [0], [0], [1], [0, 0, 1, 1], [], []>} : vector<32x32xbf16>, vector<32x8xbf16>, vector<32x8xf32> -> vector<32x8xf32>
    %c0_11 = arith.constant 0 : index
    %c0_12 = arith.constant 0 : index
    %28 = vector.load %arg20[%c0_11, %c0_12] : memref<32x32xf32, #tpu.memory_space<vmem>>, vector<32x8xf32>
    tpu.vector_store %arg20[%c0_11, %c0_12], %27 {strides = array<i32>} : memref<32x32xf32, #tpu.memory_space<vmem>>, vector<32x8xf32>,
    %29 = vector.extract_strided_slice %8 {offsets = [0, 8], sizes = [32, 8], strides = [1, 1]} : vector<32x96xbf16> to vector<32x8xbf16>
    %30 = vector.extract_strided_slice %8 {offsets = [0, 40], sizes = [32, 8], strides = [1, 1]} : vector<32x96xbf16> to vector<32x8xbf16>
    %31 = vector.extract_strided_slice %8 {offsets = [0, 72], sizes = [32, 8], strides = [1, 1]} : vector<32x96xbf16> to vector<32x8xbf16>
    %cst_13 = arith.constant dense<0.000000e+00> : vector<32x32xf32>
    %32 = tpu.matmul %29, %30, %cst_13 {dimension_numbers = #tpu.dot_dimension_numbers<[1], [1], [0], [0], [0, 0, 1, 0], [], []>} : vector<32x8xbf16>, vector<32x8xbf16>, vector<32x32xf32> -> vector<32x32xf32>
    %33 = vector.broadcast %9 : vector<1x32xf32> to vector<32x32xf32>
    %34 = arith.addf %32, %33 : vector<32x32xf32>
    %cst_14 = arith.constant dense<0xFF800000> : vector<32xf32>
    %35 = vector.multi_reduction <maximumf>, %34, %cst_14 [1] : vector<32x32xf32> to vector<32xf32>
    %36 = vector.shape_cast %35 : vector<32xf32> to vector<32x1xf32>
    %37 = vector.broadcast %36 : vector<32x1xf32> to vector<32x32xf32>
    %38 = arith.subf %34, %37 : vector<32x32xf32>
    %39 = math.exp %38 : vector<32x32xf32>
    %cst_15 = arith.constant dense<0.000000e+00> : vector<32xf32>
    %40 = vector.multi_reduction <add>, %39, %cst_15 [1] : vector<32x32xf32> to vector<32xf32>
    %41 = vector.shape_cast %40 : vector<32xf32> to vector<32x1xf32>
    %42 = tpu.reciprocal %41 {approx = true} : vector<32x1xf32> -> vector<32x1xf32>
    %43 = vector.broadcast %42 : vector<32x1xf32> to vector<32x32xf32>
    %44 = arith.mulf %39, %43 : vector<32x32xf32>
    %45 = arith.truncf %44 : vector<32x32xf32> to vector<32x32xbf16>
    %cst_16 = arith.constant dense<0.000000e+00> : vector<32x8xf32>
    %46 = tpu.matmul %45, %31, %cst_16 {dimension_numbers = #tpu.dot_dimension_numbers<[1], [0], [0], [1], [0, 0, 1, 1], [], []>} : vector<32x32xbf16>, vector<32x8xbf16>, vector<32x8xf32> -> vector<32x8xf32>
    %c0_17 = arith.constant 0 : index
    %c8 = arith.constant 8 : index
    %47 = vector.load %arg20[%c0_17, %c8] : memref<32x32xf32, #tpu.memory_space<vmem>>, vector<32x8xf32>
    tpu.vector_store %arg20[%c0_17, %c8], %46 {strides = array<i32>} : memref<32x32xf32, #tpu.memory_space<vmem>>, vector<32x8xf32>,
    %48 = vector.extract_strided_slice %8 {offsets = [0, 16], sizes = [32, 8], strides = [1, 1]} : vector<32x96xbf16> to vector<32x8xbf16>
    %49 = vector.extract_strided_slice %8 {offsets = [0, 48], sizes = [32, 8], strides = [1, 1]} : vector<32x96xbf16> to vector<32x8xbf16>
    %50 = vector.extract_strided_slice %8 {offsets = [0, 80], sizes = [32, 8], strides = [1, 1]} : vector<32x96xbf16> to vector<32x8xbf16>
    %cst_18 = arith.constant dense<0.000000e+00> : vector<32x32xf32>
    %51 = tpu.matmul %48, %49, %cst_18 {dimension_numbers = #tpu.dot_dimension_numbers<[1], [1], [0], [0], [0, 0, 1, 0], [], []>} : vector<32x8xbf16>, vector<32x8xbf16>, vector<32x32xf32> -> vector<32x32xf32>
    %52 = vector.broadcast %9 : vector<1x32xf32> to vector<32x32xf32>
    %53 = arith.addf %51, %52 : vector<32x32xf32>
    %cst_19 = arith.constant dense<0xFF800000> : vector<32xf32>
    %54 = vector.multi_reduction <maximumf>, %53, %cst_19 [1] : vector<32x32xf32> to vector<32xf32>
    %55 = vector.shape_cast %54 : vector<32xf32> to vector<32x1xf32>
    %56 = vector.broadcast %55 : vector<32x1xf32> to vector<32x32xf32>
    %57 = arith.subf %53, %56 : vector<32x32xf32>
    %58 = math.exp %57 : vector<32x32xf32>
    %cst_20 = arith.constant dense<0.000000e+00> : vector<32xf32>
    %59 = vector.multi_reduction <add>, %58, %cst_20 [1] : vector<32x32xf32> to vector<32xf32>
    %60 = vector.shape_cast %59 : vector<32xf32> to vector<32x1xf32>
    %61 = tpu.reciprocal %60 {approx = true} : vector<32x1xf32> -> vector<32x1xf32>
    %62 = vector.broadcast %61 : vector<32x1xf32> to vector<32x32xf32>
    %63 = arith.mulf %58, %62 : vector<32x32xf32>
    %64 = arith.truncf %63 : vector<32x32xf32> to vector<32x32xbf16>
    %cst_21 = arith.constant dense<0.000000e+00> : vector<32x8xf32>
    %65 = tpu.matmul %64, %50, %cst_21 {dimension_numbers = #tpu.dot_dimension_numbers<[1], [0], [0], [1], [0, 0, 1, 1], [], []>} : vector<32x32xbf16>, vector<32x8xbf16>, vector<32x8xf32> -> vector<32x8xf32>
    %c0_22 = arith.constant 0 : index
    %c16 = arith.constant 16 : index
    %66 = vector.load %arg20[%c0_22, %c16] : memref<32x32xf32, #tpu.memory_space<vmem>>, vector<32x8xf32>
    tpu.vector_store %arg20[%c0_22, %c16], %65 {strides = array<i32>} : memref<32x32xf32, #tpu.memory_space<vmem>>, vector<32x8xf32>,
    %67 = vector.extract_strided_slice %8 {offsets = [0, 24], sizes = [32, 8], strides = [1, 1]} : vector<32x96xbf16> to vector<32x8xbf16>
    %68 = vector.extract_strided_slice %8 {offsets = [0, 56], sizes = [32, 8], strides = [1, 1]} : vector<32x96xbf16> to vector<32x8xbf16>
    %69 = vector.extract_strided_slice %8 {offsets = [0, 88], sizes = [32, 8], strides = [1, 1]} : vector<32x96xbf16> to vector<32x8xbf16>
    %cst_23 = arith.constant dense<0.000000e+00> : vector<32x32xf32>
    %70 = tpu.matmul %67, %68, %cst_23 {dimension_numbers = #tpu.dot_dimension_numbers<[1], [1], [0], [0], [0, 0, 1, 0], [], []>} : vector<32x8xbf16>, vector<32x8xbf16>, vector<32x32xf32> -> vector<32x32xf32>
    %71 = vector.broadcast %9 : vector<1x32xf32> to vector<32x32xf32>
    %72 = arith.addf %70, %71 : vector<32x32xf32>
    %cst_24 = arith.constant dense<0xFF800000> : vector<32xf32>
    %73 = vector.multi_reduction <maximumf>, %72, %cst_24 [1] : vector<32x32xf32> to vector<32xf32>
    %74 = vector.shape_cast %73 : vector<32xf32> to vector<32x1xf32>
    %75 = vector.broadcast %74 : vector<32x1xf32> to vector<32x32xf32>
    %76 = arith.subf %72, %75 : vector<32x32xf32>
    %77 = math.exp %76 : vector<32x32xf32>
    %cst_25 = arith.constant dense<0.000000e+00> : vector<32xf32>
    %78 = vector.multi_reduction <add>, %77, %cst_25 [1] : vector<32x32xf32> to vector<32xf32>
    %79 = vector.shape_cast %78 : vector<32xf32> to vector<32x1xf32>
    %80 = tpu.reciprocal %79 {approx = true} : vector<32x1xf32> -> vector<32x1xf32>
    %81 = vector.broadcast %80 : vector<32x1xf32> to vector<32x32xf32>
    %82 = arith.mulf %77, %81 : vector<32x32xf32>
    %83 = arith.truncf %82 : vector<32x32xf32> to vector<32x32xbf16>
    %cst_26 = arith.constant dense<0.000000e+00> : vector<32x8xf32>
    %84 = tpu.matmul %83, %69, %cst_26 {dimension_numbers = #tpu.dot_dimension_numbers<[1], [0], [0], [1], [0, 0, 1, 1], [], []>} : vector<32x32xbf16>, vector<32x8xbf16>, vector<32x8xf32> -> vector<32x8xf32>
    %c0_27 = arith.constant 0 : index
    %c24 = arith.constant 24 : index
    %85 = vector.load %arg20[%c0_27, %c24] : memref<32x32xf32, #tpu.memory_space<vmem>>, vector<32x8xf32>
    tpu.vector_store %arg20[%c0_27, %c24], %84 {strides = array<i32>} : memref<32x32xf32, #tpu.memory_space<vmem>>, vector<32x8xf32>,
    %c0_28 = arith.constant 0 : index
    %c0_29 = arith.constant 0 : index
    %86 = vector.load %arg20[%c0_28, %c0_29] : memref<32x32xf32, #tpu.memory_space<vmem>>, vector<32x32xf32>
    %87 = arith.truncf %86 : vector<32x32xf32> to vector<32x32xbf16>
    %c0_30 = arith.constant 0 : index
    %c0_31 = arith.constant 0 : index
    %c0_32 = arith.constant 0 : index
    %88 = vector.load %arg7[%c0_30, %c0_31, %c0_32] : memref<1x32x128xbf16, #tpu.memory_space<vmem>>, vector<1x32x128xbf16>
    %89 = vector.shape_cast %88 : vector<1x32x128xbf16> to vector<32x128xbf16>
    %cst_33 = arith.constant dense<0.000000e+00> : vector<32x128xf32>
    %90 = tpu.matmul %87, %89, %cst_33 {dimension_numbers = #tpu.dot_dimension_numbers<[1], [0], [0], [1], [0, 0, 1, 1], [], []>} : vector<32x32xbf16>, vector<32x128xbf16>, vector<32x128xf32> -> vector<32x128xf32>
    %91 = arith.addf %90, %3 : vector<32x128xf32>
    %c0_34 = arith.constant 0 : index
    %c0_35 = arith.constant 0 : index
    %c0_36 = arith.constant 0 : index
    %92 = vector.load %arg8[%c0_34, %c0_35, %c0_36] : memref<1x1x128xf32, #tpu.memory_space<vmem>>, vector<1x1x128xf32>
    %93 = vector.shape_cast %92 : vector<1x1x128xf32> to vector<1x128xf32>
    %c0_37 = arith.constant 0 : index
    %c0_38 = arith.constant 0 : index
    %c0_39 = arith.constant 0 : index
    %94 = vector.load %arg9[%c0_37, %c0_38, %c0_39] : memref<1x1x128xf32, #tpu.memory_space<vmem>>, vector<1x1x128xf32>
    %95 = vector.shape_cast %94 : vector<1x1x128xf32> to vector<1x128xf32>
    %cst_40 = arith.constant dense<0.000000e+00> : vector<32xf32>
    %96 = vector.multi_reduction <add>, %91, %cst_40 [1] : vector<32x128xf32> to vector<32xf32>
    %97 = vector.shape_cast %96 : vector<32xf32> to vector<32x1xf32>
    %cst_41 = arith.constant 3.125000e-02 : f32
    %98 = vector.broadcast %cst_41 : f32 to vector<32x1xf32>
    %99 = arith.mulf %97, %98 : vector<32x1xf32>
    %100 = vector.broadcast %99 : vector<32x1xf32> to vector<32x128xf32>
    %101 = arith.subf %91, %100 : vector<32x128xf32>
    %102 = arith.mulf %101, %101 : vector<32x128xf32>
    %cst_42 = arith.constant dense<0.000000e+00> : vector<32xf32>
    %103 = vector.multi_reduction <add>, %102, %cst_42 [1] : vector<32x128xf32> to vector<32xf32>
    %104 = vector.shape_cast %103 : vector<32xf32> to vector<32x1xf32>
    %105 = arith.mulf %99, %99 : vector<32x1xf32>
    %cst_43 = arith.constant 9.600000e+01 : f32
    %106 = vector.broadcast %cst_43 : f32 to vector<32x1xf32>
    %107 = arith.mulf %106, %105 : vector<32x1xf32>
    %108 = arith.subf %104, %107 : vector<32x1xf32>
    %cst_44 = arith.constant 0.000000e+00 : f32
    %109 = vector.broadcast %cst_44 : f32 to vector<32x1xf32>
    %110 = arith.maximumf %108, %109 : vector<32x1xf32>
    %cst_45 = arith.constant 3.125000e-02 : f32
    %111 = vector.broadcast %cst_45 : f32 to vector<32x1xf32>
    %112 = arith.mulf %110, %111 : vector<32x1xf32>
    %cst_46 = arith.constant 9.99999974E-6 : f32
    %113 = vector.broadcast %cst_46 : f32 to vector<32x1xf32>
    %114 = arith.addf %112, %113 : vector<32x1xf32>
    %115 = math.rsqrt %114 : vector<32x1xf32>
    %116 = vector.broadcast %115 : vector<32x1xf32> to vector<32x128xf32>
    %117 = arith.mulf %101, %116 : vector<32x128xf32>
    %118 = vector.broadcast %93 : vector<1x128xf32> to vector<32x128xf32>
    %119 = arith.mulf %117, %118 : vector<32x128xf32>
    %120 = vector.broadcast %95 : vector<1x128xf32> to vector<32x128xf32>
    %121 = arith.addf %119, %120 : vector<32x128xf32>
    %122 = arith.truncf %121 : vector<32x128xf32> to vector<32x128xbf16>
    %c0_47 = arith.constant 0 : index
    %c0_48 = arith.constant 0 : index
    %c0_49 = arith.constant 0 : index
    %123 = vector.load %arg10[%c0_47, %c0_48, %c0_49] : memref<1x128x128xbf16, #tpu.memory_space<vmem>>, vector<1x128x128xbf16>
    %124 = vector.shape_cast %123 : vector<1x128x128xbf16> to vector<128x128xbf16>
    %cst_50 = arith.constant dense<0.000000e+00> : vector<32x128xf32>
    %125 = tpu.matmul %122, %124, %cst_50 {dimension_numbers = #tpu.dot_dimension_numbers<[1], [0], [0], [1], [0, 0, 1, 1], [], []>} : vector<32x128xbf16>, vector<128x128xbf16>, vector<32x128xf32> -> vector<32x128xf32>
    %c0_51 = arith.constant 0 : index
    %c0_52 = arith.constant 0 : index
    %c0_53 = arith.constant 0 : index
    %126 = vector.load %arg11[%c0_51, %c0_52, %c0_53] : memref<1x1x128xf32, #tpu.memory_space<vmem>>, vector<1x1x128xf32>
    %127 = vector.shape_cast %126 : vector<1x1x128xf32> to vector<1x128xf32>
    %128 = vector.broadcast %127 : vector<1x128xf32> to vector<32x128xf32>
    %129 = arith.addf %125, %128 : vector<32x128xf32>
    %cst_54 = arith.constant 5.000000e-01 : f32
    %130 = vector.broadcast %cst_54 : f32 to vector<32x128xf32>
    %131 = arith.mulf %130, %129 : vector<32x128xf32>
    %cst_55 = arith.constant 4.471500e-02 : f32
    %132 = vector.broadcast %cst_55 : f32 to vector<32x128xf32>
    %133 = arith.mulf %132, %129 : vector<32x128xf32>
    %134 = arith.mulf %133, %129 : vector<32x128xf32>
    %135 = arith.mulf %134, %129 : vector<32x128xf32>
    %136 = arith.addf %129, %135 : vector<32x128xf32>
    %cst_56 = arith.constant 0.797884583 : f32
    %137 = vector.broadcast %cst_56 : f32 to vector<32x128xf32>
    %138 = arith.mulf %137, %136 : vector<32x128xf32>
    %139 = math.tanh %138 : vector<32x128xf32>
    %cst_57 = arith.constant 1.000000e+00 : f32
    %140 = vector.broadcast %cst_57 : f32 to vector<32x128xf32>
    %141 = arith.addf %140, %139 : vector<32x128xf32>
    %142 = arith.mulf %131, %141 : vector<32x128xf32>
    %143 = arith.truncf %142 : vector<32x128xf32> to vector<32x128xbf16>
    %c0_58 = arith.constant 0 : index
    %c0_59 = arith.constant 0 : index
    %c0_60 = arith.constant 0 : index
    %144 = vector.load %arg12[%c0_58, %c0_59, %c0_60] : memref<1x128x128xbf16, #tpu.memory_space<vmem>>, vector<1x128x128xbf16>
    %145 = vector.shape_cast %144 : vector<1x128x128xbf16> to vector<128x128xbf16>
    %cst_61 = arith.constant dense<0.000000e+00> : vector<32x128xf32>
    %146 = tpu.matmul %143, %145, %cst_61 {dimension_numbers = #tpu.dot_dimension_numbers<[1], [0], [0], [1], [0, 0, 1, 1], [], []>} : vector<32x128xbf16>, vector<128x128xbf16>, vector<32x128xf32> -> vector<32x128xf32>
    %c0_62 = arith.constant 0 : index
    %c0_63 = arith.constant 0 : index
    %c0_64 = arith.constant 0 : index
    %147 = vector.load %arg13[%c0_62, %c0_63, %c0_64] : memref<1x1x128xf32, #tpu.memory_space<vmem>>, vector<1x1x128xf32>
    %148 = vector.shape_cast %147 : vector<1x1x128xf32> to vector<1x128xf32>
    %149 = vector.broadcast %148 : vector<1x128xf32> to vector<32x128xf32>
    %150 = arith.addf %146, %149 : vector<32x128xf32>
    %151 = arith.addf %150, %121 : vector<32x128xf32>
    %c0_65 = arith.constant 0 : index
    %c0_66 = arith.constant 0 : index
    %c0_67 = arith.constant 0 : index
    %152 = vector.load %arg14[%c0_65, %c0_66, %c0_67] : memref<1x1x128xf32, #tpu.memory_space<vmem>>, vector<1x1x128xf32>
    %153 = vector.shape_cast %152 : vector<1x1x128xf32> to vector<1x128xf32>
    %c0_68 = arith.constant 0 : index
    %c0_69 = arith.constant 0 : index
    %c0_70 = arith.constant 0 : index
    %154 = vector.load %arg15[%c0_68, %c0_69, %c0_70] : memref<1x1x128xf32, #tpu.memory_space<vmem>>, vector<1x1x128xf32>
    %155 = vector.shape_cast %154 : vector<1x1x128xf32> to vector<1x128xf32>
    %cst_71 = arith.constant dense<0.000000e+00> : vector<32xf32>
    %156 = vector.multi_reduction <add>, %151, %cst_71 [1] : vector<32x128xf32> to vector<32xf32>
    %157 = vector.shape_cast %156 : vector<32xf32> to vector<32x1xf32>
    %cst_72 = arith.constant 3.125000e-02 : f32
    %158 = vector.broadcast %cst_72 : f32 to vector<32x1xf32>
    %159 = arith.mulf %157, %158 : vector<32x1xf32>
    %160 = vector.broadcast %159 : vector<32x1xf32> to vector<32x128xf32>
    %161 = arith.subf %151, %160 : vector<32x128xf32>
    %162 = arith.mulf %161, %161 : vector<32x128xf32>
    %cst_73 = arith.constant dense<0.000000e+00> : vector<32xf32>
    %163 = vector.multi_reduction <add>, %162, %cst_73 [1] : vector<32x128xf32> to vector<32xf32>
    %164 = vector.shape_cast %163 : vector<32xf32> to vector<32x1xf32>
    %165 = arith.mulf %159, %159 : vector<32x1xf32>
    %cst_74 = arith.constant 9.600000e+01 : f32
    %166 = vector.broadcast %cst_74 : f32 to vector<32x1xf32>
    %167 = arith.mulf %166, %165 : vector<32x1xf32>
    %168 = arith.subf %164, %167 : vector<32x1xf32>
    %cst_75 = arith.constant 0.000000e+00 : f32
    %169 = vector.broadcast %cst_75 : f32 to vector<32x1xf32>
    %170 = arith.maximumf %168, %169 : vector<32x1xf32>
    %cst_76 = arith.constant 3.125000e-02 : f32
    %171 = vector.broadcast %cst_76 : f32 to vector<32x1xf32>
    %172 = arith.mulf %170, %171 : vector<32x1xf32>
    %cst_77 = arith.constant 9.99999974E-6 : f32
    %173 = vector.broadcast %cst_77 : f32 to vector<32x1xf32>
    %174 = arith.addf %172, %173 : vector<32x1xf32>
    %175 = math.rsqrt %174 : vector<32x1xf32>
    %176 = vector.broadcast %175 : vector<32x1xf32> to vector<32x128xf32>
    %177 = arith.mulf %161, %176 : vector<32x128xf32>
    %178 = vector.broadcast %153 : vector<1x128xf32> to vector<32x128xf32>
    %179 = arith.mulf %177, %178 : vector<32x128xf32>
    %180 = vector.broadcast %155 : vector<1x128xf32> to vector<32x128xf32>
    %181 = arith.addf %179, %180 : vector<32x128xf32>
    %c0_78 = arith.constant 0 : index
    %c0_79 = arith.constant 0 : index
    %182 = vector.load %arg19[%c0_78, %c0_79] : memref<32x128xf32, #tpu.memory_space<vmem>>, vector<32x128xf32>
    tpu.vector_store %arg19[%c0_78, %c0_79], %181 {strides = array<i32>} : memref<32x128xf32, #tpu.memory_space<vmem>>, vector<32x128xf32>,
    %c1_i32 = arith.constant 1 : i32
    %183 = arith.cmpi eq, %arg1, %c1_i32 : i32
    %184 = arith.extui %183 : i1 to i32
    %c0_i32_80 = arith.constant 0 : i32
    %185 = arith.cmpi ne, %184, %c0_i32_80 : i32
    scf.if %185 {
      %186 = vector.extract_strided_slice %181 {offsets = [16, 0], sizes = [1, 128], strides = [1, 1]} : vector<32x128xf32> to vector<1x128xf32>
      %187 = arith.truncf %186 : vector<1x128xf32> to vector<1x128xbf16>
      %c0_81 = arith.constant 0 : index
      %c0_82 = arith.constant 0 : index
      %188 = vector.load %arg16[%c0_81, %c0_82] : memref<128x128xbf16, #tpu.memory_space<vmem>>, vector<128x128xbf16>
      %cst_83 = arith.constant dense<0.000000e+00> : vector<1x128xf32>
      %189 = tpu.matmul %187, %188, %cst_83 {dimension_numbers = #tpu.dot_dimension_numbers<[1], [0], [0], [1], [0, 0, 1, 1], [], []>} : vector<1x128xbf16>, vector<128x128xbf16>, vector<1x128xf32> -> vector<1x128xf32>
      %c0_84 = arith.constant 0 : index
      %c0_85 = arith.constant 0 : index
      %190 = vector.load %arg17[%c0_84, %c0_85] : memref<1x128xf32, #tpu.memory_space<vmem>>, vector<1x128xf32>
      %191 = arith.addf %189, %190 : vector<1x128xf32>
      %c0_86 = arith.constant 0 : index
      %c0_87 = arith.constant 0 : index
      %c0_88 = arith.constant 0 : index
      %192 = vector.load %arg18[%c0_86, %c0_87, %c0_88] : memref<1x1x128xf32, #tpu.memory_space<vmem>>, vector<1x1x128xf32>
      %193 = vector.shape_cast %192 : vector<1x1x128xf32> to vector<1x128xf32>
      %194 = vector.shape_cast %191 : vector<1x128xf32> to vector<1x1x128xf32>
      tpu.vector_store %arg18[%c0_86, %c0_87, %c0_88], %194 {strides = array<i32>} : memref<1x1x128xf32, #tpu.memory_space<vmem>>, vector<1x1x128xf32>,
    } else {
    }
    return
  }
  func.func @transform_0(%arg0: i32, %arg1: i32) -> (i32, i32, i32) {
    %c0_i32 = arith.constant 0 : i32
    %c0_i32_0 = arith.constant 0 : i32
    %c0_i32_1 = arith.constant 0 : i32
    return %arg0, %c0_i32, %c0_i32_0 : i32, i32, i32
  }
  func.func @transform_1(%arg0: i32, %arg1: i32) -> (i32, i32) {
    %c0_i32 = arith.constant 0 : i32
    %c0_i32_0 = arith.constant 0 : i32
    %c0_i32_1 = arith.constant 0 : i32
    return %c0_i32, %c0_i32_0 : i32, i32
  }
  func.func @transform_2(%arg0: i32, %arg1: i32) -> (i32, i32) {
    %c0_i32 = arith.constant 0 : i32
    %c0_i32_0 = arith.constant 0 : i32
    %c0_i32_1 = arith.constant 0 : i32
    return %c0_i32, %c0_i32_0 : i32, i32
  }
  func.func @transform_3(%arg0: i32, %arg1: i32) -> (i32, i32) {
    %c0_i32 = arith.constant 0 : i32
    %c0_i32_0 = arith.constant 0 : i32
    %c0_i32_1 = arith.constant 0 : i32
    return %c0_i32, %c0_i32_0 : i32, i32
  }
  func.func @transform_4(%arg0: i32, %arg1: i32) -> (i32, i32, i32) {
    %c0_i32 = arith.constant 0 : i32
    %c0_i32_0 = arith.constant 0 : i32
    %c0_i32_1 = arith.constant 0 : i32
    return %arg1, %c0_i32, %c0_i32_0 : i32, i32, i32
  }
  func.func @transform_5(%arg0: i32, %arg1: i32) -> (i32, i32, i32) {
    %c0_i32 = arith.constant 0 : i32
    %c0_i32_0 = arith.constant 0 : i32
    %c0_i32_1 = arith.constant 0 : i32
    return %arg1, %c0_i32, %c0_i32_0 : i32, i32, i32
  }
  func.func @transform_6(%arg0: i32, %arg1: i32) -> (i32, i32, i32) {
    %c0_i32 = arith.constant 0 : i32
    %c0_i32_0 = arith.constant 0 : i32
    %c0_i32_1 = arith.constant 0 : i32
    return %arg1, %c0_i32, %c0_i32_0 : i32, i32, i32
  }
  func.func @transform_7(%arg0: i32, %arg1: i32) -> (i32, i32, i32) {
    %c0_i32 = arith.constant 0 : i32
    %c0_i32_0 = arith.constant 0 : i32
    %c0_i32_1 = arith.constant 0 : i32
    return %arg1, %c0_i32, %c0_i32_0 : i32, i32, i32
  }
  func.func @transform_8(%arg0: i32, %arg1: i32) -> (i32, i32, i32) {
    %c0_i32 = arith.constant 0 : i32
    %c0_i32_0 = arith.constant 0 : i32
    %c0_i32_1 = arith.constant 0 : i32
    return %arg1, %c0_i32, %c0_i32_0 : i32, i32, i32
  }
  func.func @transform_9(%arg0: i32, %arg1: i32) -> (i32, i32, i32) {
    %c0_i32 = arith.constant 0 : i32
    %c0_i32_0 = arith.constant 0 : i32
    %c0_i32_1 = arith.constant 0 : i32
    return %arg1, %c0_i32, %c0_i32_0 : i32, i32, i32
  }
  func.func @transform_10(%arg0: i32, %arg1: i32) -> (i32, i32, i32) {
    %c0_i32 = arith.constant 0 : i32
    %c0_i32_0 = arith.constant 0 : i32
    %c0_i32_1 = arith.constant 0 : i32
    return %arg1, %c0_i32, %c0_i32_0 : i32, i32, i32
  }
  func.func @transform_11(%arg0: i32, %arg1: i32) -> (i32, i32, i32) {
    %c0_i32 = arith.constant 0 : i32
    %c0_i32_0 = arith.constant 0 : i32
    %c0_i32_1 = arith.constant 0 : i32
    return %arg1, %c0_i32, %c0_i32_0 : i32, i32, i32
  }
  func.func @transform_12(%arg0: i32, %arg1: i32) -> (i32, i32, i32) {
    %c0_i32 = arith.constant 0 : i32
    %c0_i32_0 = arith.constant 0 : i32
    %c0_i32_1 = arith.constant 0 : i32
    return %arg1, %c0_i32, %c0_i32_0 : i32, i32, i32
  }
  func.func @transform_13(%arg0: i32, %arg1: i32) -> (i32, i32, i32) {
    %c0_i32 = arith.constant 0 : i32
    %c0_i32_0 = arith.constant 0 : i32
    %c0_i32_1 = arith.constant 0 : i32
    return %arg1, %c0_i32, %c0_i32_0 : i32, i32, i32
  }
  func.func @transform_14(%arg0: i32, %arg1: i32) -> (i32, i32) {
    %c0_i32 = arith.constant 0 : i32
    %c0_i32_0 = arith.constant 0 : i32
    %c0_i32_1 = arith.constant 0 : i32
    return %c0_i32, %c0_i32_0 : i32, i32
  }
  func.func @transform_15(%arg0: i32, %arg1: i32) -> (i32, i32) {
    %c0_i32 = arith.constant 0 : i32
    %c0_i32_0 = arith.constant 0 : i32
    %c0_i32_1 = arith.constant 0 : i32
    return %c0_i32, %c0_i32_0 : i32, i32
  }
  func.func @transform_16(%arg0: i32, %arg1: i32) -> (i32, i32, i32) {
    %c0_i32 = arith.constant 0 : i32
    %c0_i32_0 = arith.constant 0 : i32
    %c0_i32_1 = arith.constant 0 : i32
    return %arg0, %c0_i32, %c0_i32_0 : i32, i32, i32
  }
}

</mosaic_0001>

<bundles_post_ra>
// kernel: tpu_custom_call.1
= control target key start
LH: loop header
LB: loop body
LE: loop exit
PB: predicated region body
PF: predicated region fallthrough
CT: control target
= control target key end

     0   :  { %s4227_s0 = inlined_call_operand.hbm [shape: bf16[2,16,64], index: 0, kind: input, shape index: {}]   ;;  %s4228_s1 = inlined_call_operand.vmem [shape: bf16[64,128], index: 1, kind: input, shape index: {}]   ;;  %s4229_s2 = inlined_call_operand.hbm [shape: f32[32,128], index: 2, kind: input, shape index: {}]   ;;  %s4230_s3 = inlined_call_operand.vmem [shape: f32[1,32], index: 3, kind: input, shape index: {}]   ;;  %s4231_s4 = inlined_call_operand.vmem [shape: bf16[2,128,96], index: 4, kind: input, shape index: {}]   ;;  %s4232_s5 = inlined_call_operand.hbm [shape: bf16[2,32,128], index: 5, kind: input, shape index: {}]   ;;  %s4233_s6 = inlined_call_operand.vmem [shape: f32[2,1,128], index: 6, kind: input, shape index: {}]   ;;  %s4234_s7 = inlined_call_operand.vmem [shape: f32[2,1,128], index: 7, kind: input, shape index: {}]   ;;  %s4235_s8 = inlined_call_operand.vmem [shape: bf16[2,128,128], index: 8, kind: input, shape index: {}]   ;;  %s4236_s9 = inlined_call_operand.vmem [shape: f32[2,1,128], index: 9, kind: input, shape index: {}]   ;;  %s4237_s10 = inlined_call_operand.hbm [shape: bf16[2,128,128], index: 10, kind: input, shape index: {}]   ;;  %s4238_s11 = inlined_call_operand.vmem [shape: f32[2,1,128], index: 11, kind: input, shape index: {}]   ;;  %s4239_s12 = inlined_call_operand.vmem [shape: f32[2,1,128], index: 12, kind: input, shape index: {}]   ;;  %s4240_s13 = inlined_call_operand.vmem [shape: f32[2,1,128], index: 13, kind: input, shape index: {}]   ;;  %s4241_s14 = inlined_call_operand.vmem [shape: bf16[128,128], index: 14, kind: input, shape index: {}]   ;;  %s4242_s15 = inlined_call_operand.vmem [shape: f32[1,128], index: 15, kind: input, shape index: {}]   ;;  %s4243_s16 = inlined_call_operand.hbm [shape: f32[2,1,128], index: 16, kind: output, shape index: {}]  }
   0x1   :  { %4267 = sst [smem:[#allocation31_spill]] %s4227_s0 }
   0x2   :  { %4268 = sst [smem:[#allocation32_spill]] %s4228_s1 }
   0x3   :  { %4269 = sst [smem:[#allocation33_spill]] %s4229_s2 }
   0x4   :  { %4270 = sst [smem:[#allocation34_spill]] %s4230_s3 }
   0x5   :  { %4271 = sst [smem:[#allocation35_spill]] %s4231_s4 }
   0x6   :  { %4272 = sst [smem:[#allocation36_spill]] %s4232_s5 }
   0x7   :  { %4273 = sst [smem:[#allocation37_spill]] %s4235_s8 }
   0x8   :  { %4274 = sst [smem:[#allocation38_spill]] %s4236_s9 }
   0x9   :  { %4275 = sst [smem:[#allocation39_spill]] %s4237_s10 }
   0xa   :  { %4276 = sst [smem:[#allocation40_spill]] %s4238_s11 }
   0xb   :  { %4277 = sst [smem:[#allocation41_spill]] %s4239_s12 }
   0xc   :  { %4278 = sst [smem:[#allocation42_spill]] %s4240_s13 }
   0xd   :  { %4279 = sst [smem:[#allocation43_spill]] %s4241_s14 }
   0xe   :  { %4280 = sst [smem:[#allocation44_spill]] %s4242_s15 }
   0xf   :  { %4281 = sst [smem:[#allocation45_spill]] %s4243_s16 }
  0x10   :  { %21 = vsyncpa [#allocation5], 0 }
  0x11   :  { %23 = vsyncpa [#allocation5 + $0x1], 0 }
  0x12   :  { %24 = vsyncpa [#allocation8], 0 }
  0x13   :  { %25 = vsyncpa [#allocation6], 0 }
  0x14   :  { %27 = vsyncpa [#allocation6 + $0x1], 0  ;;  %s3592_s21 = smov 0   ;;  %s3594_s22 = smov 0  }
  0x15   :  { %s3596_s23 = smov 0   ;;  %s3598_s24 = smov 0  }
  0x16   :  { %s3600_s25 = smov 0   ;;  %s3602_s26 = smov 0  }
  0x17   :  { %s3604_s27 = smov 0   ;;  %s3606_s28 = smov 0  }
  0x18   :  { %s3608_s29 = smov 0   ;;  %s3610_s30 = smov 0  }
  0x19   :  { %s3612_s0 = smov 0  }
  0x1a LB: > { %4282 = sst [smem:[#allocation16_spill]] %s3442_s22  ;;  %p59_p0 = scmp.ne.s32.totalorder %s3458_s26, %s3454_s25  ;;  %s3478_s0 = sphi %s3612_s0, %s33_s0   ;;  %s3474_s30 = sphi %s3610_s30, %s4350_s30   ;;  %s3470_s29 = sphi %s3608_s29, %s4349_s29   ;;  %s3466_s28 = sphi %s3606_s28, %s4348_s28   ;;  %s3462_s27 = sphi %s3604_s27, %s4347_s27   ;;  %s3458_s26 = sphi %s3602_s26, %s4346_s26   ;;  %s3454_s25 = sphi %s3600_s25, %s4345_s25   ;;  %s3450_s24 = sphi %s3598_s24, %s4344_s24   ;;  %s3446_s23 = sphi %s3596_s23, %s4343_s23   ;;  %s3442_s22 = sphi %s3594_s22, %s4342_s22   ;;  %s3438_s21 = sphi %s3592_s21, %s4341_s21  }
  0x1b   : > { %4283 = sst [smem:[#allocation17_spill]] %s3446_s23  ;;  %p60_p1 = scmp.eq.s32.totalorder %s3478_s0, 0 }
  0x1c   : > { %4284 = sst [smem:[#allocation18_spill]] %s3450_s24  ;;  %p2999_p2 = scmp.lt.s32.totalorder %s3478_s0, 4 }
  0x1d   : > { %4285 = sst [smem:[#allocation19_spill]] %s3454_s25  ;;  %p61_p3 = por %p60_p1, %p59_p0 }
  0x1e   : > { %4286 = sst [smem:[#allocation20_spill]] %s3458_s26  ;;  %s505_s19 = sand.u32 1, %s3478_s0  }
  0x1f   : > { %4287 = sst [smem:[#allocation21_spill]] %s3466_s28  ;;  %s507_s20 = sand.u32 1, %s3458_s26  }
  0x20   : > { %4288 = sst [smem:[#allocation22_spill]] %s3470_s29  ;;  %s2623_s16 = sshll.u32 %s507_s20, 3 }
  0x21   : > { %4289 = sst [smem:[#allocation23_spill]] %s3474_s30  ;;  %s2711_s28 = sshll.u32 %s3474_s30, 7 }
  0x22   : > { %4290 = sst [smem:[#allocation24_spill]] %s3478_s0  ;;  %s509_s13 = scalar_lea.vmem [#allocation4], %s2623_s16 }
  0x23   : > { %s4291_s3 = sld [smem:[#allocation31_spill]]  ;;  %s516_s12 = sshll.u32 %s509_s13, 4  ;;  %s517_s12 = int_to_ptr.vmem [resolvable:$true] %s516_s12 }
  0x24   : > { %p3666_p4 = pnand %p2999_p2, %p61_p3  ;;  %s3670_s18 = scalar_lea.sflag [#allocation5], %s505_s19 }
  0x25   : > { %s3253_s11 = scalar_lea.vmem %s517_s12, 128  ;;  %s3480_s20 = smov [#allocation4]  }
  0x26   : > { %p3242_p5 = pneg %p3666_p4  ;;  %p3254_p6 = scmp.ne.s32.totalorder %s517_s12, %s3253_s11 }
  0x27   : > { %s3258_s14 = sshll.u32 %s3480_s20, 4  ;;  %s3259_s14 = int_to_ptr.vmem [resolvable:$false] %s3258_s14 }
  0x28   : > { %p3256_p7 = pnand %p3254_p6, %p3242_p5  ;;  %p3261_p9 = scmp.lt.s32.totalorder %s517_s12, %s3259_s14 }
  0x29   : > { %s515_s1 = scalar_lea.hbm %s4291_s3, %s2711_s28  ;;  %s3260_s3 = scalar_lea.vmem %s3259_s14, 256 }
  0x2a   : > { %p3257_p8 = pneg %p3256_p7  ;;  %p3262_p10 = scmp.lt.s32.totalorder %s3260_s3, %s3253_s11 }
  0x2c   : > { %p3263_p11 = por %p3262_p10, %p3261_p9 }
  0x2e   : > { %p3264_p12 = pnand %p3263_p11, %p3257_p8 }
  0x30   : > { %3267 = shalt.err (!%p3264_p12)
}
  0x31   : > { %s4247_s13 = smov 64   ;;  %s4249_s15 = smov 4  }
  0x32   : > { %2987 = dma.hbm_to_vmem [thread:$0]  (!%p3666_p4), %s515_s1, 128, %s517_s12, %s3670_s18, %s4247_s13, %s4247_s13, %s4249_s15  }
  0x33   : > { %s42_s11 = sadd.s32 1, %s3470_s29  ;;  %s167_s16 = sadd.s32 1, %s3446_s23 }
  0x34   : > { %p43_p13 = scmp.ge.s32.totalorder %s42_s11, 2  ;;  %p174_p3 = scmp.ne.s32.totalorder %s3446_s23, %s3442_s22 }
  0x35   : > { %s536_s28 = sand.u32 1, %s3446_s23   ;;  %s2712_s19 = sshll.u32 %s3470_s29, 8 }
  0x36   : > { %s4352_s11 = smov (%p43_p13, %s42_s11), 0  ;;  %s4294_s20 = sadd.s32 1, %s3474_s30 }
  0x37   : > { %4293 = sst [smem:[#allocation25_spill]] %s4352_s11  ;;  %s4354_s20 = smov (!%p43_p13, %s4294_s20), %s3474_s30 }
  0x38   : > { %s164_s17 = ssub.s32 %s3470_s29, %s4352_s11  ;;  %p176_p5 = por %p174_p3, %p60_p1 }
  0x39   : > { %p47_p4 = scmp.ge.s32.totalorder %s4354_s20, 2  ;;  %p165_p6 = scmp.eq.s32.totalorder %s164_s17, 0 }
  0x3a   : > { %s2626_s1 = sshll.u32 %s536_s28, 4  ;;  %s4295_s5 = sld [smem:[#allocation36_spill]] }
  0x3b   : > { %s4356_s20 = smov (%p47_p4, %s4354_s20), 0  ;;  %s538_s9 = scalar_lea.vmem [#allocation9], %s2626_s1 }
  0x3c   : > { %4296 = sst [smem:[#allocation26_spill]] %s4356_s20  ;;  %s49_s15 = ssub.s32 %s3474_s30, %s4356_s20 }
  0x3d   : > { %s3703_s13 = scalar_select %p165_p6, %s3446_s23, %s167_s16  }
  0x3e   : > { %p50_p7 = scmp.eq.s32.totalorder %s49_s15, 0  ;;  %s545_s8 = sshll.u32 %s538_s9, 4  ;;  %s546_s8 = int_to_ptr.vmem [resolvable:$true] %s545_s8 }
  0x3f   : > { %4297 = sst [smem:[#allocation27_spill]] %s3703_s13  ;;  %p3709_p1 = pnand %p2999_p2, %p176_p5 }
  0x40   : > { %s544_s3 = scalar_lea.hbm %s4295_s5, %s2712_s19  ;;  %s4299_s17 = sadd.s32 1, %s3458_s26 }
  0x41   : > { %s3716_s12 = scalar_select %p50_p7, %s3458_s26, %s4299_s17  }
  0x42   : > { %p4252_p8 = pneg %p3709_p1  ;;  %s3281_s19 = scalar_lea.vmem %s546_s8, 256 }
  0x43   : > { %4300 = sst [smem:[#allocation28_spill]] %s3716_s12  ;;  %p3282_p9 = scmp.ne.s32.totalorder %s546_s8, %s3281_s19 }
  0x44   : > { %s3483_s9 = smov [#allocation9]  }
  0x45   : > { %p3284_p10 = pnand %p3282_p9, %p4252_p8  ;;  %s3286_s15 = sshll.u32 %s3483_s9, 4  ;;  %s3287_s15 = int_to_ptr.vmem [resolvable:$false] %s3286_s15 }
  0x46   : > { %s3288_s16 = scalar_lea.vmem %s3287_s15, 512  ;;  %p3289_p2 = scmp.lt.s32.totalorder %s546_s8, %s3287_s15 }
  0x47   : > { %p3285_p11 = pneg %p3284_p10  ;;  %p3290_p12 = scmp.lt.s32.totalorder %s3288_s16, %s3281_s19 }
  0x49   : > { %p3291_p13 = por %p3290_p12, %p3289_p2 }
  0x4b   : > { %p3292_p3 = pnand %p3291_p13, %p3285_p11 }
  0x4d   : > { %3295 = shalt.err (!%p3292_p3)
}
  0x4e   : > { %s4301_s1 = smov 4   ;;  %s4302_s14 = smov 64  }
  0x4f   : > { %2990 = dma.hbm_to_vmem [thread:$0]  (!%p3709_p1), %s544_s3, 256, %s546_s8, %s3670_s18, %s4302_s14, %s4302_s14, %s4301_s1  }
  0x50   : > { %s3730_s17 = sadd.s32 4294967295, %s3478_s0   ;;  %s2619_s19 = sadd.s32 4294967294, %s3478_s0  }
  0x51   : > { %p65_p5 = scmp.ne.s32.totalorder %s3454_s25, %s3450_s24  ;;  %p4258_p4 = scmp.eq.s32.totalorder %s3730_s17, 0 }
  0x52   : > { %p180_p6 = scmp.ne.s32.totalorder %s3442_s22, %s3438_s21  ;;  %p454_p7 = scmp.eq.s32.totalorder %s3730_s17, 3 }
  0x53   : > { %p460_p9 = scmp.eq.s32.totalorder %s2619_s19, 3  ;;  %p3741_p10 = por %p4258_p4, %p65_p5 }
  0x54   : > { %p3747_p11 = por %p180_p6, %p4258_p4  ;;  %p3754_p2 = por %p454_p7, %p59_p0 }
  0x55   : > { %p3758_p12 = por %p460_p9, %p65_p5  ;;  %p2620_p13 = scmp.ge.s32.totalorder %s3478_s0, 1 }
  0x56   : > { %s4305_s3 = scalar_select %p3754_p2, 1, 0 }
  0x57   : > { %s4307_s21 = scalar_select %p3758_p12, 1, 0 }
  0x58   : > { %4306 = sst [smem:[#allocation29_spill]] %s4305_s3  ;;  %p467_p3 = scmp.lt.s32.totalorder %s3478_s0, 5 }
  0x59   : > { %4308 = sst [smem:[#allocation30_spill]] %s4307_s21  ;;  %s3484_s16 = smov [#allocation7]  }
  0x5a   : > { %p3764_p8 = pnand %p2620_p13, %p467_p3  ;;  %s482_s19 = sshll.u32 %s3484_s16, 4  ;;  %s483_s19 = int_to_ptr.vmem [resolvable:$true] %s482_s19 }
  0x5b   : > { %s2629_s5 = sshll.u32 %s536_s28, 6  ;;  %s2713_s20 = sshll.u32 %s3470_s29, 10 }
  0x5c   : > { %p2980_p6 = pneg %p3764_p8  ;;  %s4311_s10 = sld [smem:[#allocation39_spill]] }
  0x5d   : > { %s585_s21 = scalar_lea.vmem [#allocation10], %s2629_s5  ;;  %s3307_s16 = scalar_lea.vmem %s483_s19, 512 }
  0x5e   : > { %p3775_p0 = pnand %p2980_p6, %p4258_p4  ;;  %s592_s24 = sshll.u32 %s585_s21, 4  ;;  %s3784_s24 = int_to_ptr.vmem [resolvable:$true] %s592_s24 }
  0x5f   : > { %p3308_p7 = scmp.ne.s32.totalorder %s483_s19, %s3307_s16  ;;  %p3315_p3 = scmp.lt.s32.totalorder %s483_s19, %s483_s19 }
  0x60   : > { %p3298_p5 = pneg %p3775_p0  ;;  %p3316_p6 = scmp.lt.s32.totalorder %s3307_s16, %s3307_s16 }
  0x62   : > { %s3782_s13 = scalar_lea.hbm %s4311_s10, %s2713_s20  ;;  %p3310_p9 = pnand %p3308_p7, %p3298_p5 }
  0x63   : > { %p3317_p4 = por %p3316_p6, %p3315_p3 }
  0x64   : > { %p3311_p13 = pneg %p3310_p9 }
  0x66   : > { %p3318_p12 = pnand %p3317_p4, %p3311_p13 }
  0x68   : > { %3321 = shalt.err (!%p3318_p12)
}
  0x69   : > { %s3485_s28 = smov 128   ;;  %s3486_s5 = smov 8  }
  0x6a   : > { %s4312_s2 = sld [smem:[#allocation33_spill]]  ;;  %s3335_s12 = scalar_lea.vmem %s3784_s24, 1024 }
  0x6b   : > { %p3336_p5 = scmp.ne.s32.totalorder %s3784_s24, %s3335_s12  ;;  %p4313_p7 = pneg %p3709_p1 }
  0x6c   : > { %s3487_s21 = smov [#allocation10]  }
  0x6d   : > { %p3338_p9 = pnand %p3336_p5, %p4313_p7  ;;  %s3340_s16 = sshll.u32 %s3487_s21, 4  ;;  %s3341_s16 = int_to_ptr.vmem [resolvable:$false] %s3340_s16 }
  0x6e   : > { %s3342_s10 = scalar_lea.vmem %s3341_s16, 2048  ;;  %p3343_p4 = scmp.lt.s32.totalorder %s3784_s24, %s3341_s16 }
  0x6f   : > { %p3339_p3 = pneg %p3338_p9  ;;  %p3344_p12 = scmp.lt.s32.totalorder %s3342_s10, %s3335_s12 }
  0x70   : > { %2983 = dma.hbm_to_vmem [thread:$0]  (!%p3775_p0), %s4312_s2, 512, %s483_s19, [#allocation8], %s3485_s28, %s3485_s28, %s3486_s5  }
  0x71   : > { %p3345_p13 = por %p3344_p12, %p3343_p4 }
  0x73   : > { %p3346_p6 = pnand %p3345_p13, %p3339_p3 }
  0x75   : > { %3349 = shalt.err (!%p3346_p6)
}
  0x76   : > { %2993 = dma.hbm_to_vmem [thread:$0]  (!%p3709_p1), %s3782_s13, 1024, %s3784_s24, %s3670_s18, %s4302_s14, %s4302_s14, %s4301_s1  }
  0x77   : > { %622 = sbr.rel (%p3764_p8) target bundleno = 4721 (0x1271), region = 84  ;;  %s624_s30 = sand.u32 (!%p3764_p8), 1, %s3730_s17  }
  0x78   : > { %s3811_s10 = sand.u32 (!%p3764_p8), 1, %s3454_s25   ;;  %s625_s28 = scalar_lea.sflag (!%p3764_p8), [#allocation5], %s624_s30 }
  0x79   : > { %s2633_s19 = sshll.u32 (!%p3764_p8), %s3811_s10, 3 }
  0x7a   : > { %s3814_s11 = scalar_lea.vmem (!%p3764_p8), [#allocation4], %s2633_s19 }
  0x7c   : > { %3421 = dma.done.wait (%p3741_p10), %s625_s28, 128  }
  0x7d   : > { %3423 = vsyncadd (%p3741_p10), %s625_s28, 4294967168  ;;  %p4314_p1 = scmp.eq.s32.totalorder %s3730_s17, 0 }
  0x7f   : > { %3425 = dma.done.wait (%p4314_p1), [#allocation8], 512   ;;  %p4315_p8 = pmov %p4314_p1 }
  0x80   : > { %s639_s24 = sand.u32 1, %s3442_s22  }
  0x81   : > { %3427 = vsyncadd (%p4315_p8), [#allocation8], 4294966784  ;;  %s3825_s18 = sshll.u32 %s639_s24, 4 }
  0x82   : > { %3429 = dma.done.wait (%p3747_p11), %s625_s28, 1280  }
  0x83   : > { %3431 = vsyncadd (%p3747_p11), %s625_s28, 4294966016  ;;  %s2636_s1 = sshll.u32 %s639_s24, 6  ;;  %p736_p10 = scmp.lt.s32.totalorder %s3462_s27, 1 }
  0x84   : > { %s4316_s4 = sld [smem:[#allocation35_spill]]  ;;  %s3871_s3 = scalar_lea.vmem [#allocation10], %s2636_s1 }
  0x85   : > { %s3834_s14 = scalar_select %p736_p10, %s3462_s27, 1 }
  0x86   : > { %s4317_s28 = sld [smem:[#allocation37_spill]]  ;;  %p2641_p11 = scmp.ne.s32.totalorder %s3462_s27, 0 }
  0x87   : > { %s2714_s17 = sshll.u32 %s3834_s14, 6  ;;  %s4318_s29 = sld [smem:[#allocation38_spill]] }
  0x88   : > { %s4319_s8 = sld [smem:[#allocation40_spill]] }
  0x89   : > { %s4321_s21 = sld [smem:[#allocation42_spill]] }
  0x8a   : > { %s3844_s20 = scalar_lea.vmem %s4316_s4, %s2714_s17  ;;  %s4320_s4 = sld [smem:[#allocation41_spill]] }
  0x8b   : > { %s4322_s13 = sld [smem:[#allocation32_spill]] (!%p2641_p11) }
  0x8c   : > { %s3853_s24 = scalar_lea.vmem %s4317_s28, %s2714_s17  ;;  %s735_s17 = scalar_lea.vmem [#allocation11], %s3811_s10 }
  0x8d   : > { %s754_s25 = scalar_lea.vmem %s4318_s29, %s3834_s14  ;;  %768 = sbr.rel (%p2641_p11) target bundleno = 363 (0x16b), region = 104 }
  0x8e   : > { %s757_s23 = scalar_lea.vmem %s4319_s8, %s3834_s14 }
  0x8f   : > { %s763_s16 = scalar_lea.vmem %s4321_s21, %s3834_s14 }
  0x90   : > { %s760_s22 = scalar_lea.vmem %s4320_s4, %s3834_s14 }
  0x92   : > { %v3113_v0 = vld [vmem:[%s4322_s13 + $0x18] sm:$0xff]   ;;  %v3488_v1 = vmov 0.0   ;;  %v3114_v2 = vld [vmem:[%s4322_s13 + $0x10] sm:$0xff]   ;;  %vm3489_vm0 = vmmov 0   ;;  %v3115_v3 = vld [vmem:[%s4322_s13 + $0x8] sm:$0xff]   ;;  %vm810_vm1 = vcmask 523264  }
  0x93   : > { %2796 = vmatprep.subr.bf16.mxu0 %v3488_v1  ;;  %2804 = vmatprep.mubr.msk.bf16.mxu0 %vm3489_vm0, %v3488_v1  ;;  %v3116_v4 = vld [vmem:[%s4322_s13] sm:$0xff]   ;;  %v858_v7 = vld [vmem:[#allocation7 + $0x18] sm:$0xff]  ;;  %v779_v8 = vld [vmem:[#allocation7] sm:$0xff] }
  0x94   : > { %2797 = vmatpush3.bf16.msra.mxu0 %v3113_v0  ;;  %v3117_v5 = vld [vmem:[%s3814_s11] sm:$0xff]   ;;  %860 = vst [vmem:[#allocation2 + $0x8] sm:$0xff] %v858_v7  ;;  %v780_v12 = vld [vmem:[#allocation7 + $0x8] sm:$0xff] }
  0x95   : > { %2798 = vmatprep.subr.bf16.mxu0 %v3488_v1  ;;  %v857_v6 = vld [vmem:[#allocation7 + $0x10] sm:$0xff] }
  0x96   : > { %859 = vst [vmem:[#allocation2 + $0x18] sm:$0xff] %v857_v6 }
  0x98   : > { %2799 = vmatpush3.bf16.msra.mxu0 %v3114_v2 }
  0x99   : > { %2800 = vmatprep.subr.bf16.mxu0 %v3488_v1 }
  0x9c   : > { %2801 = vmatpush3.bf16.msra.mxu0 %v3115_v3 }
  0x9d   : > { %2802 = vmatprep.subr.bf16.mxu0 %v3488_v1 }
  0xa0   : > { %2803 = vmatpush3.bf16.msra.mxu0 %v3116_v4 }
  0xa3   : > { %2805 = vmatmul.mubr.msk.bf16.vlgmr.msra.gmra.mxu0 %vm810_vm1, %v3117_v5 }
 0x163   : > { %v848_v9 = vpop.f32.mrf.mxu0 }
 0x164   : > { %v849_v10 = vadd.f32 %v848_v9, %v779_v8 }
 0x165   : > { %v2806_v11 = vpop.f32.mrf.mxu0 }
 0x166   : > { %855 = vst [vmem:[#allocation2 + $0x10] sm:$0xff] %v849_v10 }
 0x167   : > { %v851_v13 = vpop.f32.mrf.mxu0 }
 0x168   : > { %v852_v14 = vadd.f32 %v851_v13, %v780_v12 }
 0x169   : > { %v2807_v15 = vpop.f32.mrf.mxu0 }
 0x16a   : > { %856 = vst [vmem:[#allocation2] sm:$0xff] %v852_v14 }
 0x16b PF: > { %v3118_v16 = vld [vmem:[%s3844_s20 + $0x38] sm:$0xff]   ;;  %v3119_v17 = vld [vmem:[%s3844_s20 + $0x30] sm:$0xff]   ;;  %v3120_v18 = vld [vmem:[%s3844_s20 + $0x28] sm:$0xff]   ;;  %vm995_vm2 = vcmask 64512   ;;  %s3490_s11 = smov 96   ;;  %s4323_s9 = sld [smem:[#allocation34_spill]] }
 0x16c   : > { %2808 = vmatprep.subr.bf16.mxu0 %v3118_v16  ;;  %v3121_v19 = vld [vmem:[%s3844_s20 + $0x20] sm:$0xff]   ;;  %v3122_v20 = vld [vmem:[%s3844_s20 + $0x18] sm:$0xff]   ;;  %v3123_v21 = vld [vmem:[%s3844_s20 + $0x10] sm:$0xff]   ;;  %vm1057_vm3 = vcmask 261120   ;;  %s3491_s15 = smov 64   ;;  %s3492_s5 = smov 88  }
 0x16d   : > { %2809 = vmatpush3.bf16.msra.mxu0 %v3118_v16  ;;  %v3124_v22 = vld [vmem:[%s3844_s20 + $0x8] sm:$0xff]   ;;  %v3125_v23 = vld [vmem:[%s3844_s20] sm:$0xff]   ;;  %v3896_v24 = vld [vmem:[#allocation2 + $0x18] sm:$0xff]  ;;  %s3493_s26 = smov 120   ;;  %s3494_s12 = smov 56   ;;  %vm1361_vm4 = vcmask 130112  }
 0x16e   : > { %2810 = vmatprep.subr.bf16.mxu0 %v3119_v17  ;;  %v3898_v25 = vld [vmem:[#allocation2 + $0x8] sm:$0xff]  ;;  %s3495_s21 = smov 80   ;;  %s3496_s2 = smov 112   ;;  %vm1558_vm5 = vcmask 195712   ;;  %vm1755_vm6 = vcmask 261312  }
 0x16f   : > { %v866_v26 = vpack.c.bf16 %v3898_v25, %v3896_v24  ;;  %s3497_s29 = smov 48   ;;  %s3498_s8 = smov 72  }
 0x170   : > { %s3499_s4 = smov 104   ;;  %s3500_s0 = smov 40  }
 0x171   : > { %2811 = vmatpush3.bf16.msra.mxu0 %v3119_v17  ;;  %v3919_v37 = vld [vmem:[%s4323_s9] ss:$0 sm:$0xff]  ;;  %s3501_s1 = smov 8   ;;  %s3502_s30 = smov 16  }
 0x172   : > { %2812 = vmatprep.subr.bf16.mxu0 %v3120_v18  ;;  %s4324_s19 = scalar_lea.vmem [#allocation9], %s3825_s18  ;;  %s3503_s20 = smov 24  }
 0x173   : > { %s4326_s28 = scalar_lea.vmem %s4233_s6, %s3834_s14  ;;  %p2699_p0 = scmp.ne.s32.totalorder %s3462_s27, 1 }
 0x175   : > { %2813 = vmatpush3.bf16.msra.mxu0 %v3120_v18 }
 0x176   : > { %2814 = vmatprep.subr.bf16.mxu0 %v3121_v19 }
 0x179   : > { %2815 = vmatpush3.bf16.msra.mxu0 %v3121_v19 }
 0x17a   : > { %2816 = vmatprep.subr.bf16.mxu0 %v3122_v20 }
 0x17d   : > { %2817 = vmatpush3.bf16.msra.mxu0 %v3122_v20 }
 0x17e   : > { %2818 = vmatprep.subr.bf16.mxu0 %v3123_v21 }
 0x181   : > { %2819 = vmatpush3.bf16.msra.mxu0 %v3123_v21 }
 0x182   : > { %2820 = vmatprep.subr.bf16.mxu0 %v3124_v22 }
 0x185   : > { %2821 = vmatpush3.bf16.msra.mxu0 %v3124_v22 }
 0x186   : > { %2822 = vmatprep.subr.bf16.mxu0 %v3125_v23 }
 0x189   : > { %2823 = vmatpush3.bf16.msra.mxu0 %v3125_v23 }
 0x18c   : > { %2825 = vmatmul.mubr.bf16.vlgmr.msra.gmra.mxu0 %v866_v26 }
 0x24c   : > { %v2826_v27 = vpop.f32.mrf.mxu0 }
 0x24e   : > { %v965_v28 = vpop.f32.mrf.mxu0 }
 0x250   : > { %v2827_v29 = vpop.f32.mrf.mxu0 }
 0x251   : > { %v3902_v30 = vpack.c.bf16 %v2827_v29, %v2826_v27 }
 0x252   : > { %v968_v31 = vpop.f32.mrf.mxu0 }
 0x253   : > { %v3904_v32 = vpack.c.bf16 %v968_v31, %v965_v28  ;;  %993 = vrot.lane.b32.xlu0 %v3902_v30, %s3490_s11 }
 0x255   : > { %2832 = vmatprep.mubr.msk.bf16.mxu1 %vm995_vm2, %v3904_v32 }
 0x257   : > { %991 = vrot.lane.b32.xlu0 %v3904_v32, %s3490_s11  ;;  %s4325_s11 = smov %s4324_s19 }
 0x2c5   : > { %v994_v33 = vpop.permute.xlu0 %993 }
 0x2c6   : > { %2960 = vmatprep.subr.msk.bf16.mxu1 %vm995_vm2, %v994_v33  ;;  %v1006_v34 = vsel %vm995_vm2, %v994_v33, 0 }
 0x2c7   : > { %2829 = vmatpush3.bf16.xpose.msra.mxu1 %v1006_v34 }
 0x2c9   : > { %v992_v35 = vpop.permute.xlu0 %991 }
 0x2ca   : > { %2961 = vmatprep.subr.msk.bf16.mxu1 %vm995_vm2, %v992_v35  ;;  %v1003_v36 = vsel %vm995_vm2, %v992_v35, 0 }
 0x2cf   : > { %2831 = vmatpush3.bf16.xpose.msra.mxu1 %v1003_v36 }
 0x2d6   : > { %2833 = vmatmul.mubr.msk.bf16.vlgmr.msra.gmra.mxu1 %vm995_vm2, %v3902_v30 }
 0x396   : > { %v2834_v38 = vpop.f32.mrf.mxu1 }
 0x397   : > { %v1051_v39 = vadd.f32 %v2834_v38, %v3919_v37 }
 0x398   : > { %v1042_v40 = vpop.f32.mrf.mxu1 }
 0x399   : > { %v1043_v41 = vadd.f32 %v3919_v37, %v1042_v40  ;;  %v1064_v42 = vsel %vm1057_vm3, %v1051_v39, -inf }
 0x39a   : > { %1065 = vmax.xlane.f32.xlu0 %v1064_v42  ;;  %v2835_v43 = vpop.f32.mrf.mxu1 }
 0x39b   : > { %v1058_v44 = vsel %vm1057_vm3, %v1043_v41, -inf  ;;  %v1054_v47 = vadd.f32 %v2835_v43, %v3919_v37 }
 0x39c   : > { %v1045_v45 = vpop.f32.mrf.mxu1  ;;  %1059 = vmax.xlane.f32.xlu1 %v1058_v44 }
 0x39d   : > { %v1046_v46 = vadd.f32 %v3919_v37, %v1045_v45  ;;  %v1067_v49 = vsel %vm1057_vm3, %v1054_v47, -inf }
 0x39f   : > { %v1061_v48 = vsel %vm1057_vm3, %v1046_v46, -inf }
 0x3a0   : > { %1062 = vmax.xlane.f32.xlu1 %v1061_v48 }
 0x3a4   : > { %1068 = vmax.xlane.f32.xlu1 %v1067_v49 }
 0x3b0   : > { %1104 = vrot.lane.b32.xlu0 %v3904_v32, %s3491_s15 }
 0x3b5   : > { %1106 = vrot.lane.b32.xlu1 %v3902_v30, %s3491_s15 }
 0x423   : > { %v1066_v50 = vpop.xlane.xlu0 %1065 }
 0x424   : > { %v1072_v51 = vsub.f32 %v1051_v39, %v1066_v50 }
 0x425   : > { %v1060_v52 = vpop.xlane.xlu1 %1059 }
 0x426   : > { %v1078_v53 = vmul.f32 1.442695, %v1072_v51  ;;  %v1070_v54 = vsub.f32 %v1043_v41, %v1060_v52 }
 0x427   : > { %v1105_v63 = vpop.permute.xlu0 %1104 }
 0x428   : > { %3144 = vpow2.f32 %v1078_v53  ;;  %v1074_v55 = vmul.f32 1.442695, %v1070_v54 }
 0x429   : > { %v1063_v56 = vpop.xlane.xlu1 %1062 }
 0x42a   : > { %3146 = vpow2.f32 %v1074_v55  ;;  %v1071_v57 = vsub.f32 %v1046_v46, %v1063_v56 }
 0x42c   : > { %v1076_v60 = vmul.f32 1.442695, %v1071_v57 }
 0x42d   : > { %v1069_v58 = vpop.xlane.xlu1 %1068 }
 0x42e   : > { %v1073_v59 = vsub.f32 %v1054_v47, %v1069_v58 }
 0x430   : > { %v1080_v61 = vmul.f32 1.442695, %v1073_v59 }
 0x431   : > { %v1107_v62 = vpop.permute.xlu1 %1106 }
 0x432   : > { %3148 = vpow2.f32 %v1080_v61  ;;  %2836 = vmatprep.subr.bf16.mxu1 %v1107_v62 }
 0x433   : > { %2837 = vmatpush3.bf16.msra.mxu1 %v1107_v62  ;;  %3150 = vpow2.f32 %v1076_v60 }
 0x434   : > { %2838 = vmatprep.subr.bf16.mxu1 %v1105_v63 }
 0x435   : > { %v3145_v0 = vpop.eup %3144 }
 0x436   : > { %v1088_v1 = vsel %vm1057_vm3, %v3145_v0, 0.0 }
 0x437   : > { %v3147_v2 = vpop.eup %3146  ;;  %1089 = vadd.xlane.f32.xlu1 %v1088_v1  ;;  %2839 = vmatpush3.bf16.msra.mxu1 %v1105_v63 }
 0x438   : > { %v1082_v3 = vsel %vm1057_vm3, %v3147_v2, 0.0 }
 0x43b   : > { %1083 = vadd.xlane.f32.xlu1 %v1082_v3 }
 0x43f   : > { %v3149_v4 = vpop.eup %3148 }
 0x440   : > { %v1091_v5 = vsel %vm1057_vm3, %v3149_v4, 0.0  ;;  %v3151_v6 = vpop.eup %3150 }
 0x441   : > { %1092 = vadd.xlane.f32.xlu1 %v1091_v5  ;;  %v1085_v7 = vsel %vm1057_vm3, %v3151_v6, 0.0 }
 0x445   : > { %1086 = vadd.xlane.f32.xlu1 %v1085_v7 }
 0x456   : > { %1175 = vrot.lane.b32.xlu1 %v3902_v30, %s3492_s5 }
 0x45a   : > { %1173 = vrot.lane.b32.xlu1 %v3904_v32, %s3492_s5  ;;  %s4327_s5 = scalar_lea.vmem %s4234_s7, %s3834_s14 }
 0x45e   : > { %1169 = vrot.lane.b32.xlu1 %v3904_v32, %s3493_s26 }
 0x462   : > { %1171 = vrot.lane.b32.xlu1 %v3902_v30, %s3493_s26 }
 0x4c0   : > { %v1090_v8 = vpop.xlane.xlu1 %1089 }
 0x4c4   : > { %v1084_v9 = vpop.xlane.xlu1 %1083 }
 0x4ca   : > { %v1093_v10 = vpop.xlane.xlu1 %1092 }
 0x4cb   : > { %3152 = vrcp.f32 %v1093_v10 }
 0x4cc   : > { %3154 = vrcp.f32 %v1084_v9 }
 0x4cd   : > { %3156 = vrcp.f32 %v1090_v8 }
 0x4ce   : > { %v1087_v11 = vpop.xlane.xlu1 %1086 }
 0x4cf   : > { %3158 = vrcp.f32 %v1087_v11 }
 0x4d2   : > { %v1176_v12 = vpop.permute.xlu1 %1175 }
 0x4d3   : > { %2962 = vmatprep.subr.msk.bf16.mxu1 %vm995_vm2, %v1176_v12  ;;  %v1187_v26 = vsel %vm995_vm2, %v1176_v12, 0 }
 0x4d6   : > { %v1174_v17 = vpop.permute.xlu1 %1173 }
 0x4d7   : > { %v1184_v28 = vsel %vm995_vm2, %v1174_v17, 0 }
 0x4d8   : > { %v3153_v13 = vpop.eup %3152 }
 0x4d9   : > { %v3155_v14 = vpop.eup %3154  ;;  %v1101_v18 = vmul.f32 %v3153_v13, %v3149_v4 }
 0x4da   : > { %v3157_v15 = vpop.eup %3156  ;;  %v1098_v19 = vmul.f32 %v3155_v14, %v3147_v2  ;;  %v1170_v27 = vpop.permute.xlu1 %1169 }
 0x4db   : > { %v1100_v21 = vmul.f32 %v3157_v15, %v3145_v0 }
 0x4dc   : > { %v3159_v16 = vpop.eup %3158 }
 0x4dd   : > { %v1099_v20 = vmul.f32 %v3159_v16, %v3151_v6  ;;  %v1103_v23 = vpack.c.bf16 %v1101_v18, %v1100_v21 }
 0x4de   : > { %v1172_v29 = vpop.permute.xlu1 %1171 }
 0x4df   : > { %v1102_v22 = vpack.c.bf16 %v1099_v20, %v1098_v19 }
 0x4e1   : > { %2840 = vmatprep.mubr.msk.bf16.mxu1 %vm1057_vm3, %v1102_v22 }
 0x4e2   : > { %2841 = vmatmul.mubr.msk.bf16.vlgmr.msra.gmra.mxu1 %vm1057_vm3, %v1103_v23 }
 0x4e3   : > { %2845 = vmatpush3.bf16.xpose.msra.mxu1 %v1187_v26  ;;  %2848 = vmatprep.mubr.msk.bf16.mxu1 %vm995_vm2, %v1170_v27 }
 0x4e4   : > { %2963 = vmatprep.subr.msk.bf16.mxu1 %vm995_vm2, %v1174_v17 }
 0x4eb   : > { %2847 = vmatpush3.bf16.xpose.msra.mxu1 %v1184_v28 }
 0x4f2   : > { %2849 = vmatmul.mubr.msk.bf16.vlgmr.msra.gmra.mxu1 %vm995_vm2, %v1172_v29 }
 0x5a2   : > { %v2842_v31 = vpop.f32.mrf.mxu1 }
 0x5a3   : > { %1167 = vst.msk [vmem:[#allocation3 + $0x10] sm:$0xff] %vm995_vm2, %v2842_v31 }
 0x5a4   : > { %v1150_v33 = vpop.f32.mrf.mxu1 }
 0x5a5   : > { %1165 = vst.msk [vmem:[#allocation3] sm:$0xff] %vm995_vm2, %v1150_v33 }
 0x5a6   : > { %v2843_v34 = vpop.f32.mrf.mxu1 }
 0x5a7   : > { %1168 = vst.msk [vmem:[#allocation3 + $0x18] sm:$0xff] %vm995_vm2, %v2843_v34 }
 0x5a8   : > { %v1153_v35 = vpop.f32.mrf.mxu1 }
 0x5a9   : > { %1166 = vst.msk [vmem:[#allocation3 + $0x8] sm:$0xff] %vm995_vm2, %v1153_v35 }
 0x5b2   : > { %v2850_v36 = vpop.f32.mrf.mxu1 }
 0x5b3   : > { %v1232_v41 = vadd.f32 %v2850_v36, %v3919_v37 }
 0x5b4   : > { %v1223_v38 = vpop.f32.mrf.mxu1 }
 0x5b5   : > { %v1224_v39 = vadd.f32 %v3919_v37, %v1223_v38  ;;  %v1244_v47 = vsel %vm1057_vm3, %v1232_v41, -inf }
 0x5b6   : > { %v2851_v40 = vpop.f32.mrf.mxu1 }
 0x5b7   : > { %v1238_v42 = vsel %vm1057_vm3, %v1224_v39, -inf  ;;  %v1235_v45 = vadd.f32 %v2851_v40, %v3919_v37 }
 0x5b8   : > { %v1226_v43 = vpop.f32.mrf.mxu1  ;;  %1239 = vmax.xlane.f32.xlu0 %v1238_v42 }
 0x5b9   : > { %v1227_v44 = vadd.f32 %v3919_v37, %v1226_v43  ;;  %v1247_v48 = vsel %vm1057_vm3, %v1235_v45, -inf }
 0x5bb   : > { %v1241_v46 = vsel %vm1057_vm3, %v1227_v44, -inf }
 0x5bc   : > { %1242 = vmax.xlane.f32.xlu1 %v1241_v46  ;;  %1245 = vmax.xlane.f32.xlu0 %v1244_v47 }
 0x5c0   : > { %1248 = vmax.xlane.f32.xlu0 %v1247_v48 }
 0x5cd   : > { %1286 = vrot.lane.b32.xlu1 %v3902_v30, %s3494_s12 }
 0x641   : > { %v1240_v49 = vpop.xlane.xlu0 %1239 }
 0x642   : > { %v1250_v50 = vsub.f32 %v1224_v39, %v1240_v49 }
 0x644   : > { %v1254_v56 = vmul.f32 1.442695, %v1250_v50 }
 0x645   : > { %v1243_v51 = vpop.xlane.xlu1 %1242  ;;  %v1246_v52 = vpop.xlane.xlu0 %1245 }
 0x646   : > { %v1252_v53 = vsub.f32 %v1232_v41, %v1246_v52  ;;  %v1251_v54 = vsub.f32 %v1227_v44, %v1243_v51 }
 0x648   : > { %v1258_v55 = vmul.f32 1.442695, %v1252_v53  ;;  %v1256_v60 = vmul.f32 1.442695, %v1251_v54 }
 0x649   : > { %v1287_v57 = vpop.permute.xlu1 %1286  ;;  %v1249_v58 = vpop.xlane.xlu0 %1248 }
 0x64a   : > { %v1253_v59 = vsub.f32 %v1235_v45, %v1249_v58  ;;  %2852 = vmatprep.subr.bf16.mxu0 %v1287_v57  ;;  %3160 = vpow2.f32 %v1258_v55 }
 0x64b   : > { %2853 = vmatpush3.bf16.msra.mxu0 %v1287_v57  ;;  %3162 = vpow2.f32 %v1254_v56 }
 0x64c   : > { %v1260_v61 = vmul.f32 1.442695, %v1253_v59 }
 0x64e   : > { %3164 = vpow2.f32 %v1260_v61 }
 0x64f   : > { %3166 = vpow2.f32 %v1256_v60 }
 0x657   : > { %v3161_v62 = vpop.eup %3160 }
 0x658   : > { %v1268_v63 = vsel %vm1057_vm3, %v3161_v62, 0.0  ;;  %v3163_v0 = vpop.eup %3162 }
 0x659   : > { %1269 = vadd.xlane.f32.xlu1 %v1268_v63  ;;  %v1262_v4 = vsel %vm1057_vm3, %v3163_v0, 0.0 }
 0x65b   : > { %v3165_v1 = vpop.eup %3164 }
 0x65c   : > { %v1271_v2 = vsel %vm1057_vm3, %v3165_v1, 0.0  ;;  %v3167_v3 = vpop.eup %3166 }
 0x65d   : > { %1272 = vadd.xlane.f32.xlu0 %v1271_v2  ;;  %1263 = vadd.xlane.f32.xlu1 %v1262_v4  ;;  %v1265_v5 = vsel %vm1057_vm3, %v3167_v3, 0.0 }
 0x661   : > { %1266 = vadd.xlane.f32.xlu0 %v1265_v5 }
 0x66e   : > { %1372 = vrot.lane.b32.xlu1 %v3902_v30, %s3495_s21 }
 0x672   : > { %1370 = vrot.lane.b32.xlu1 %v3904_v32, %s3495_s21 }
 0x676   : > { %1368 = vrot.lane.b32.xlu1 %v3902_v30, %s3496_s2 }
 0x677   : > { %1284 = vrot.lane.b32.xlu0 %v3904_v32, %s3494_s12 }
 0x67b   : > { %1366 = vrot.lane.b32.xlu0 %v3904_v32, %s3496_s2  ;;  %s4333_s2 = sld [smem:[#allocation44_spill]] (!%p2699_p0) }
 0x6e2   : > { %v1270_v6 = vpop.xlane.xlu1 %1269 }
 0x6e6   : > { %v1273_v7 = vpop.xlane.xlu0 %1272  ;;  %v1264_v8 = vpop.xlane.xlu1 %1263 }
 0x6e7   : > { %3168 = vrcp.f32 %v1273_v7 }
 0x6e8   : > { %3170 = vrcp.f32 %v1264_v8 }
 0x6e9   : > { %3172 = vrcp.f32 %v1270_v6 }
 0x6ea   : > { %v1267_v9 = vpop.xlane.xlu0 %1266  ;;  %v1373_v11 = vpop.permute.xlu1 %1372 }
 0x6eb   : > { %3174 = vrcp.f32 %v1267_v9  ;;  %v1384_v22 = vsel %vm995_vm2, %v1373_v11, 0 }
 0x6ee   : > { %v1285_v10 = vpop.permute.xlu0 %1284  ;;  %v1371_v26 = vpop.permute.xlu1 %1370 }
 0x6ef   : > { %2854 = vmatprep.subr.bf16.mxu0 %v1285_v10  ;;  %v1381_v27 = vsel %vm995_vm2, %v1371_v26, 0 }
 0x6f0   : > { %2855 = vmatpush3.bf16.msra.mxu0 %v1285_v10 }
 0x6f1   : > { %2964 = vmatprep.subr.msk.bf16.mxu0 %vm995_vm2, %v1373_v11 }
 0x6f2   : > { %v1367_v23 = vpop.permute.xlu0 %1366  ;;  %v1369_v28 = vpop.permute.xlu1 %1368 }
 0x6f4   : > { %v3169_v12 = vpop.eup %3168 }
 0x6f5   : > { %v3171_v13 = vpop.eup %3170  ;;  %v1281_v16 = vmul.f32 %v3169_v12, %v3165_v1 }
 0x6f6   : > { %v3173_v14 = vpop.eup %3172  ;;  %v1278_v17 = vmul.f32 %v3171_v13, %v3163_v0 }
 0x6f7   : > { %v1280_v19 = vmul.f32 %v3173_v14, %v3161_v62 }
 0x6f8   : > { %v3175_v15 = vpop.eup %3174 }
 0x6f9   : > { %v1279_v18 = vmul.f32 %v3175_v15, %v3167_v3  ;;  %v1283_v21 = vpack.c.bf16 %v1281_v16, %v1280_v19 }
 0x6fb   : > { %v1282_v20 = vpack.c.bf16 %v1279_v18, %v1278_v17 }
 0x6fd   : > { %2856 = vmatprep.mubr.msk.bf16.mxu0 %vm1057_vm3, %v1282_v20 }
 0x6fe   : > { %2857 = vmatmul.mubr.msk.bf16.vlgmr.msra.gmra.mxu0 %vm1057_vm3, %v1283_v21 }
 0x6ff   : > { %2861 = vmatpush3.bf16.xpose.msra.mxu0 %v1384_v22  ;;  %2864 = vmatprep.mubr.msk.bf16.mxu0 %vm995_vm2, %v1367_v23 }
 0x700   : > { %2965 = vmatprep.subr.msk.bf16.mxu0 %vm995_vm2, %v1371_v26 }
 0x707   : > { %2863 = vmatpush3.bf16.xpose.msra.mxu0 %v1381_v27 }
 0x70e   : > { %2865 = vmatmul.mubr.msk.bf16.vlgmr.msra.gmra.mxu0 %vm995_vm2, %v1369_v28 }
 0x7be   : > { %v3979_v29 = vpop.f32.mrf.mxu0 }
 0x7c0   : > { %v3981_v31 = vpop.f32.mrf.mxu0 }
 0x7c2   : > { %v3983_v33 = vpop.f32.mrf.mxu0 }
 0x7c4   : > { %v3985_v34 = vpop.f32.mrf.mxu0 }
 0x7ce   : > { %v2866_v35 = vpop.f32.mrf.mxu0 }
 0x7cf   : > { %v1429_v40 = vadd.f32 %v2866_v35, %v3919_v37 }
 0x7d0   : > { %v1420_v36 = vpop.f32.mrf.mxu0 }
 0x7d1   : > { %v1421_v38 = vadd.f32 %v3919_v37, %v1420_v36  ;;  %v1441_v46 = vsel %vm1057_vm3, %v1429_v40, -inf }
 0x7d2   : > { %v2867_v39 = vpop.f32.mrf.mxu0 }
 0x7d3   : > { %v1435_v41 = vsel %vm1057_vm3, %v1421_v38, -inf  ;;  %v1432_v44 = vadd.f32 %v2867_v39, %v3919_v37 }
 0x7d4   : > { %v1423_v42 = vpop.f32.mrf.mxu0  ;;  %1436 = vmax.xlane.f32.xlu0 %v1435_v41 }
 0x7d5   : > { %v1424_v43 = vadd.f32 %v3919_v37, %v1423_v42  ;;  %v1444_v47 = vsel %vm1057_vm3, %v1432_v44, -inf }
 0x7d7   : > { %v1438_v45 = vsel %vm1057_vm3, %v1424_v43, -inf }
 0x7d8   : > { %1439 = vmax.xlane.f32.xlu1 %v1438_v45  ;;  %1442 = vmax.xlane.f32.xlu0 %v1441_v46 }
 0x7dc   : > { %1445 = vmax.xlane.f32.xlu0 %v1444_v47 }
 0x7e9   : > { %1483 = vrot.lane.b32.xlu1 %v3902_v30, %s3497_s29 }
 0x85d   : > { %v1437_v48 = vpop.xlane.xlu0 %1436 }
 0x85e   : > { %v1447_v49 = vsub.f32 %v1421_v38, %v1437_v48 }
 0x860   : > { %v1451_v55 = vmul.f32 1.442695, %v1447_v49 }
 0x861   : > { %v1440_v50 = vpop.xlane.xlu1 %1439  ;;  %v1443_v51 = vpop.xlane.xlu0 %1442 }
 0x862   : > { %v1449_v52 = vsub.f32 %v1429_v40, %v1443_v51  ;;  %v1448_v53 = vsub.f32 %v1424_v43, %v1440_v50 }
 0x864   : > { %v1455_v54 = vmul.f32 1.442695, %v1449_v52  ;;  %v1453_v59 = vmul.f32 1.442695, %v1448_v53 }
 0x865   : > { %v1484_v56 = vpop.permute.xlu1 %1483  ;;  %v1446_v57 = vpop.xlane.xlu0 %1445 }
 0x866   : > { %v1450_v58 = vsub.f32 %v1432_v44, %v1446_v57  ;;  %2868 = vmatprep.subr.bf16.mxu1 %v1484_v56  ;;  %3176 = vpow2.f32 %v1455_v54 }
 0x867   : > { %2869 = vmatpush3.bf16.msra.mxu1 %v1484_v56  ;;  %3178 = vpow2.f32 %v1451_v55 }
 0x868   : > { %v1457_v60 = vmul.f32 1.442695, %v1450_v58 }
 0x86a   : > { %3180 = vpow2.f32 %v1457_v60 }
 0x86b   : > { %3182 = vpow2.f32 %v1453_v59 }
 0x873   : > { %v3177_v61 = vpop.eup %3176 }
 0x874   : > { %v1465_v62 = vsel %vm1057_vm3, %v3177_v61, 0.0  ;;  %v3179_v63 = vpop.eup %3178 }
 0x875   : > { %1466 = vadd.xlane.f32.xlu1 %v1465_v62  ;;  %v1459_v3 = vsel %vm1057_vm3, %v3179_v63, 0.0 }
 0x877   : > { %v3181_v0 = vpop.eup %3180 }
 0x878   : > { %v1468_v1 = vsel %vm1057_vm3, %v3181_v0, 0.0  ;;  %v3183_v2 = vpop.eup %3182 }
 0x879   : > { %1469 = vadd.xlane.f32.xlu0 %v1468_v1  ;;  %1460 = vadd.xlane.f32.xlu1 %v1459_v3  ;;  %v1462_v4 = vsel %vm1057_vm3, %v3183_v2, 0.0 }
 0x87d   : > { %1463 = vadd.xlane.f32.xlu0 %v1462_v4 }
 0x88a   : > { %1569 = vrot.lane.b32.xlu1 %v3902_v30, %s3498_s8 }
 0x88e   : > { %1567 = vrot.lane.b32.xlu1 %v3904_v32, %s3498_s8 }
 0x892   : > { %1565 = vrot.lane.b32.xlu1 %v3902_v30, %s3499_s4 }
 0x893   : > { %1481 = vrot.lane.b32.xlu0 %v3904_v32, %s3497_s29 }
 0x897   : > { %1563 = vrot.lane.b32.xlu0 %v3904_v32, %s3499_s4 }
 0x8fe   : > { %v1467_v5 = vpop.xlane.xlu1 %1466 }
 0x902   : > { %v1470_v6 = vpop.xlane.xlu0 %1469  ;;  %v1461_v7 = vpop.xlane.xlu1 %1460 }
 0x903   : > { %3184 = vrcp.f32 %v1470_v6 }
 0x904   : > { %3186 = vrcp.f32 %v1461_v7 }
 0x905   : > { %3188 = vrcp.f32 %v1467_v5 }
 0x906   : > { %v1464_v8 = vpop.xlane.xlu0 %1463  ;;  %v1570_v10 = vpop.permute.xlu1 %1569 }
 0x907   : > { %3190 = vrcp.f32 %v1464_v8  ;;  %v1581_v21 = vsel %vm995_vm2, %v1570_v10, 0 }
 0x90a   : > { %v1482_v9 = vpop.permute.xlu0 %1481  ;;  %v1568_v23 = vpop.permute.xlu1 %1567 }
 0x90b   : > { %2870 = vmatprep.subr.bf16.mxu1 %v1482_v9  ;;  %v1578_v26 = vsel %vm995_vm2, %v1568_v23, 0 }
 0x90c   : > { %2871 = vmatpush3.bf16.msra.mxu1 %v1482_v9 }
 0x90d   : > { %2966 = vmatprep.subr.msk.bf16.mxu1 %vm995_vm2, %v1570_v10 }
 0x90e   : > { %v1564_v22 = vpop.permute.xlu0 %1563  ;;  %v1566_v27 = vpop.permute.xlu1 %1565 }
 0x910   : > { %v3185_v11 = vpop.eup %3184 }
 0x911   : > { %v3187_v12 = vpop.eup %3186  ;;  %v1478_v15 = vmul.f32 %v3185_v11, %v3181_v0 }
 0x912   : > { %v3189_v13 = vpop.eup %3188  ;;  %v1475_v16 = vmul.f32 %v3187_v12, %v3179_v63 }
 0x913   : > { %v1477_v18 = vmul.f32 %v3189_v13, %v3177_v61 }
 0x914   : > { %v3191_v14 = vpop.eup %3190 }
 0x915   : > { %v1476_v17 = vmul.f32 %v3191_v14, %v3183_v2  ;;  %v1480_v20 = vpack.c.bf16 %v1478_v15, %v1477_v18 }
 0x917   : > { %v1479_v19 = vpack.c.bf16 %v1476_v17, %v1475_v16 }
 0x919   : > { %2872 = vmatprep.mubr.msk.bf16.mxu1 %vm1057_vm3, %v1479_v19 }
 0x91a   : > { %2873 = vmatmul.mubr.msk.bf16.vlgmr.msra.gmra.mxu1 %vm1057_vm3, %v1480_v20 }
 0x91b   : > { %2877 = vmatpush3.bf16.xpose.msra.mxu1 %v1581_v21  ;;  %2880 = vmatprep.mubr.msk.bf16.mxu1 %vm995_vm2, %v1564_v22 }
 0x91c   : > { %2967 = vmatprep.subr.msk.bf16.mxu1 %vm995_vm2, %v1568_v23 }
 0x923   : > { %2879 = vmatpush3.bf16.xpose.msra.mxu1 %v1578_v26  ;;  %v3126_v26 = vld [vmem:[%s4324_s19 + $0x8] sm:$0xff]  }
 0x92a   : > { %2881 = vmatmul.mubr.msk.bf16.vlgmr.msra.gmra.mxu1 %vm995_vm2, %v1566_v27  ;;  %v3127_v27 = vld [vmem:[%s4325_s11] sm:$0xff]  }
 0x9da   : > { %v2874_v28 = vpop.f32.mrf.mxu1 }
 0x9dc   : > { %v1527_v35 = vpop.f32.mrf.mxu1 }
 0x9de   : > { %v2875_v36 = vpop.f32.mrf.mxu1 }
 0x9e0   : > { %v1530_v38 = vpop.f32.mrf.mxu1 }
 0x9ea   : > { %v2882_v39 = vpop.f32.mrf.mxu1 }
 0x9eb   : > { %v1626_v43 = vadd.f32 %v2882_v39, %v3919_v37 }
 0x9ec   : > { %v1617_v40 = vpop.f32.mrf.mxu1 }
 0x9ed   : > { %v1618_v41 = vadd.f32 %v3919_v37, %v1617_v40  ;;  %v1638_v49 = vsel %vm1057_vm3, %v1626_v43, -inf }
 0x9ee   : > { %v2883_v42 = vpop.f32.mrf.mxu1 }
 0x9ef   : > { %v1632_v44 = vsel %vm1057_vm3, %v1618_v41, -inf  ;;  %v1629_v47 = vadd.f32 %v2883_v42, %v3919_v37 }
 0x9f0   : > { %v1620_v45 = vpop.f32.mrf.mxu1  ;;  %1633 = vmax.xlane.f32.xlu0 %v1632_v44 }
 0x9f1   : > { %v1621_v46 = vadd.f32 %v3919_v37, %v1620_v45  ;;  %v1641_v50 = vsel %vm1057_vm3, %v1629_v47, -inf }
 0x9f3   : > { %v1635_v48 = vsel %vm1057_vm3, %v1621_v46, -inf }
 0x9f4   : > { %1636 = vmax.xlane.f32.xlu1 %v1635_v48  ;;  %1639 = vmax.xlane.f32.xlu0 %v1638_v49 }
 0x9f8   : > { %1642 = vmax.xlane.f32.xlu0 %v1641_v50  ;;  %v4049_v50 = vld [vmem:[#allocation2 + $0x10] sm:$0xff] }
 0xa79   : > { %v1634_v51 = vpop.xlane.xlu0 %1633 }
 0xa7a   : > { %v1644_v52 = vsub.f32 %v1618_v41, %v1634_v51 }
 0xa7c   : > { %v1648_v58 = vmul.f32 1.442695, %v1644_v52 }
 0xa7d   : > { %v1637_v53 = vpop.xlane.xlu1 %1636  ;;  %v1640_v54 = vpop.xlane.xlu0 %1639 }
 0xa7e   : > { %v1646_v55 = vsub.f32 %v1626_v43, %v1640_v54  ;;  %v1645_v56 = vsub.f32 %v1621_v46, %v1637_v53  ;;  %v4052_v54 = vld [vmem:[#allocation2] sm:$0xff] }
 0xa80   : > { %v1652_v57 = vmul.f32 1.442695, %v1646_v55  ;;  %v1650_v37 = vmul.f32 1.442695, %v1645_v56 }
 0xa81   : > { %v1643_v59 = vpop.xlane.xlu0 %1642 }
 0xa82   : > { %v1647_v60 = vsub.f32 %v1629_v47, %v1643_v59  ;;  %3192 = vpow2.f32 %v1652_v57 }
 0xa83   : > { %3194 = vpow2.f32 %v1648_v58 }
 0xa84   : > { %v1654_v61 = vmul.f32 1.442695, %v1647_v60 }
 0xa86   : > { %3196 = vpow2.f32 %v1654_v61 }
 0xa87   : > { %3198 = vpow2.f32 %v1650_v37 }
 0xa8f   : > { %v3193_v62 = vpop.eup %3192 }
 0xa90   : > { %v1662_v63 = vsel %vm1057_vm3, %v3193_v62, 0.0  ;;  %v3195_v0 = vpop.eup %3194 }
 0xa91   : > { %1663 = vadd.xlane.f32.xlu1 %v1662_v63  ;;  %v1656_v4 = vsel %vm1057_vm3, %v3195_v0, 0.0 }
 0xa93   : > { %v3197_v1 = vpop.eup %3196 }
 0xa94   : > { %v1665_v2 = vsel %vm1057_vm3, %v3197_v1, 0.0  ;;  %v3199_v3 = vpop.eup %3198 }
 0xa95   : > { %1666 = vadd.xlane.f32.xlu0 %v1665_v2  ;;  %1657 = vadd.xlane.f32.xlu1 %v1656_v4  ;;  %v1659_v5 = vsel %vm1057_vm3, %v3199_v3, 0.0 }
 0xa99   : > { %1660 = vadd.xlane.f32.xlu0 %v1659_v5 }
 0xaa6   : > { %1680 = vrot.lane.b32.xlu1 %v3902_v30, %s3500_s0 }
 0xaaa   : > { %1349 = vrot.lane.b32.xlu1 %v3981_v31, %s3501_s1 }
 0xaae   : > { %1351 = vrot.lane.b32.xlu1 %v3985_v34, %s3501_s1 }
 0xaaf   : > { %1678 = vrot.lane.b32.xlu0 %v3904_v32, %s3500_s0 }
 0xab2   : > { %1355 = vrot.lane.b32.xlu1 %v3983_v33, %s3501_s1 }
 0xab3   : > { %1353 = vrot.lane.b32.xlu0 %v3979_v29, %s3501_s1 }
 0xab6   : > { %1548 = vrot.lane.b32.xlu1 %v1530_v38, %s3502_s30 }
 0xab7   : > { %1546 = vrot.lane.b32.xlu0 %v1527_v35, %s3502_s30 }
 0xaba   : > { %1552 = vrot.lane.b32.xlu1 %v2875_v36, %s3502_s30 }
 0xabb   : > { %1550 = vrot.lane.b32.xlu0 %v2874_v28, %s3502_s30 }
 0xb1a   : > { %v1664_v6 = vpop.xlane.xlu1 %1663 }
 0xb1e   : > { %v1667_v7 = vpop.xlane.xlu0 %1666  ;;  %v1658_v8 = vpop.xlane.xlu1 %1657 }
 0xb1f   : > { %3200 = vrcp.f32 %v1667_v7 }
 0xb20   : > { %3202 = vrcp.f32 %v1658_v8  ;;  %v3128_v8 = vld [vmem:[%s3853_s24 + $0x38] sm:$0xff]  }
 0xb21   : > { %3204 = vrcp.f32 %v1664_v6  ;;  %2900 = vmatprep.subr.bf16.mxu1 %v3128_v8 }
 0xb22   : > { %v1661_v30 = vpop.xlane.xlu0 %1660  ;;  %v1681_v31 = vpop.permute.xlu1 %1680  ;;  %2901 = vmatpush3.bf16.msra.mxu1 %v3128_v8  ;;  %v3141_v8 = vld [vmem:[%s3871_s3 + $0x10] sm:$0xff]  }
 0xb23   : > { %3206 = vrcp.f32 %v1661_v30  ;;  %2884 = vmatprep.subr.bf16.mxu0 %v1681_v31  ;;  %v3129_v30 = vld [vmem:[%s3853_s24 + $0x30] sm:$0xff]  }
 0xb24   : > { %2885 = vmatpush3.bf16.msra.mxu0 %v1681_v31  ;;  %2902 = vmatprep.subr.bf16.mxu1 %v3129_v30  ;;  %v3130_v31 = vld [vmem:[%s3853_s24 + $0x28] sm:$0xff]  }
 0xb26   : > { %v1679_v32 = vpop.permute.xlu0 %1678  ;;  %v1350_v33 = vpop.permute.xlu1 %1349  ;;  %2903 = vmatpush3.bf16.msra.mxu1 %v3129_v30  ;;  %v3142_v30 = vld [vmem:[%s3871_s3 + $0x8] sm:$0xff]  }
 0xb27   : > { %2886 = vmatprep.subr.bf16.mxu0 %v1679_v32  ;;  %1362 = vst.msk [vmem:[#allocation3] sm:$0xff] %vm1361_vm4, %v1350_v33  ;;  %2904 = vmatprep.subr.bf16.mxu1 %v3130_v31  ;;  %v3132_v33 = vld [vmem:[%s3853_s24 + $0x18] sm:$0xff]  }
 0xb28   : > { %2887 = vmatpush3.bf16.msra.mxu0 %v1679_v32  ;;  %v3131_v32 = vld [vmem:[%s3853_s24 + $0x20] sm:$0xff]  }
 0xb29   : > { %2892 = vmatprep.subr.bf16.mxu0 %v3126_v26 }
 0xb2a   : > { %v1354_v29 = vpop.permute.xlu0 %1353  ;;  %v1352_v34 = vpop.permute.xlu1 %1351  ;;  %2905 = vmatpush3.bf16.msra.mxu1 %v3130_v31  ;;  %v3143_v31 = vld [vmem:[%s3871_s3] sm:$0xff]  }
 0xb2b   : > { %1364 = vst.msk [vmem:[#allocation3 + $0x10] sm:$0xff] %vm1361_vm4, %v1354_v29  ;;  %1363 = vst.msk [vmem:[#allocation3 + $0x8] sm:$0xff] %vm1361_vm4, %v1352_v34  ;;  %2906 = vmatprep.subr.bf16.mxu1 %v3131_v32  ;;  %v3133_v29 = vld [vmem:[%s3853_s24 + $0x10] sm:$0xff]   ;;  %v3134_v34 = vld [vmem:[%s3853_s24 + $0x8] sm:$0xff]  }
 0xb2c   : > { %v3201_v9 = vpop.eup %3200 }
 0xb2d   : > { %v3203_v10 = vpop.eup %3202  ;;  %v1675_v15 = vmul.f32 %v3201_v9, %v3197_v1  ;;  %v3135_v9 = vld [vmem:[%s3853_s24] sm:$0xff]  }
 0xb2e   : > { %v1547_v11 = vpop.permute.xlu0 %1546  ;;  %v3205_v12 = vpop.eup %3204  ;;  %v1672_v16 = vmul.f32 %v3203_v10, %v3195_v0  ;;  %2907 = vmatpush3.bf16.msra.mxu1 %v3131_v32 }
 0xb2f   : > { %v1356_v13 = vpop.permute.xlu1 %1355  ;;  %1559 = vst.msk [vmem:[#allocation3] sm:$0xff] %vm1558_vm5, %v1547_v11  ;;  %v1674_v19 = vmul.f32 %v3205_v12, %v3193_v62  ;;  %2908 = vmatprep.subr.bf16.mxu1 %v3132_v33 }
 0xb30   : > { %v3207_v14 = vpop.eup %3206  ;;  %1365 = vst.msk [vmem:[#allocation3 + $0x18] sm:$0xff] %vm1361_vm4, %v1356_v13 }
 0xb31   : > { %v1673_v17 = vmul.f32 %v3207_v14, %v3199_v3  ;;  %v1677_v22 = vpack.c.bf16 %v1675_v15, %v1674_v19 }
 0xb32   : > { %v1551_v18 = vpop.permute.xlu0 %1550  ;;  %2909 = vmatpush3.bf16.msra.mxu1 %v3132_v33 }
 0xb33   : > { %v1549_v20 = vpop.permute.xlu1 %1548  ;;  %1561 = vst.msk [vmem:[#allocation3 + $0x10] sm:$0xff] %vm1558_vm5, %v1551_v18  ;;  %v1676_v21 = vpack.c.bf16 %v1673_v17, %v1672_v16  ;;  %2910 = vmatprep.subr.bf16.mxu1 %v3133_v29 }
 0xb34   : > { %1560 = vst.msk [vmem:[#allocation3 + $0x8] sm:$0xff] %vm1558_vm5, %v1549_v20 }
 0xb35   : > { %2888 = vmatprep.mubr.msk.bf16.mxu0 %vm1057_vm3, %v1676_v21 }
 0xb36   : > { %2889 = vmatmul.mubr.msk.bf16.vlgmr.msra.gmra.mxu0 %vm1057_vm3, %v1677_v22  ;;  %2911 = vmatpush3.bf16.msra.mxu1 %v3133_v29 }
 0xb37   : > { %v1553_v23 = vpop.permute.xlu1 %1552  ;;  %2893 = vmatpush3.bf16.msra.mxu0 %v3126_v26  ;;  %2912 = vmatprep.subr.bf16.mxu1 %v3134_v34 }
 0xb38   : > { %1562 = vst.msk [vmem:[#allocation3 + $0x18] sm:$0xff] %vm1558_vm5, %v1553_v23  ;;  %2894 = vmatprep.subr.bf16.mxu0 %v3127_v27 }
 0xb3a   : > { %2913 = vmatpush3.bf16.msra.mxu1 %v3134_v34 }
 0xb3b   : > { %2895 = vmatpush3.bf16.msra.mxu0 %v3127_v27  ;;  %2914 = vmatprep.subr.bf16.mxu1 %v3135_v9 }
 0xb3e   : > { %2915 = vmatpush3.bf16.msra.mxu1 %v3135_v9 }
 0xbf6   : > { %v2890_v28 = vpop.f32.mrf.mxu0 }
 0xbf8   : > { %v1724_v35 = vpop.f32.mrf.mxu0 }
 0xbf9   : > { %1743 = vrot.lane.b32.xlu0 %v1724_v35, %s3503_s20 }
 0xbfa   : > { %v2891_v36 = vpop.f32.mrf.mxu0 }
 0xbfc   : > { %v1727_v38 = vpop.f32.mrf.mxu0 }
 0xbfd   : > { %1747 = vrot.lane.b32.xlu0 %v2890_v28, %s3503_s20  ;;  %1745 = vrot.lane.b32.xlu1 %v1727_v38, %s3503_s20 }
 0xc01   : > { %1749 = vrot.lane.b32.xlu1 %v2891_v36, %s3503_s20 }
 0xc6b   : > { %v1744_v39 = vpop.permute.xlu0 %1743 }
 0xc6c   : > { %1756 = vst.msk [vmem:[#allocation3] sm:$0xff] %vm1755_vm6, %v1744_v39 }
 0xc6f   : > { %v1746_v40 = vpop.permute.xlu1 %1745  ;;  %v1748_v41 = vpop.permute.xlu0 %1747 }
 0xc70   : > { %1757 = vst.msk [vmem:[#allocation3 + $0x8] sm:$0xff] %vm1755_vm6, %v1746_v40  ;;  %1758 = vst.msk [vmem:[#allocation3 + $0x10] sm:$0xff] %vm1755_vm6, %v1748_v41 }
 0xc73   : > { %v1750_v42 = vpop.permute.xlu1 %1749  ;;  %v1760_v43 = vld [vmem:[#allocation3] sm:$0xff] }
 0xc74   : > { %1759 = vst.msk [vmem:[#allocation3 + $0x18] sm:$0xff] %vm1755_vm6, %v1750_v42 }
 0xc77   : > { %v1761_v44 = vld [vmem:[#allocation3 + $0x8] sm:$0xff]  ;;  %v1762_v46 = vld [vmem:[#allocation3 + $0x10] sm:$0xff] }
 0xc78   : > { %v1764_v45 = vpack.c.bf16 %v1761_v44, %v1760_v43 }
 0xc7a   : > { %2896 = vmatprep.mubr.msk.bf16.mxu0 %vm1057_vm3, %v1764_v45 }
 0xc7b   : > { %v1763_v47 = vld [vmem:[#allocation3 + $0x18] sm:$0xff] }
 0xc7c   : > { %v1765_v48 = vpack.c.bf16 %v1763_v47, %v1762_v46 }
 0xc7e   : > { %2897 = vmatmul.mubr.msk.bf16.vlgmr.msra.gmra.mxu0 %vm1057_vm3, %v1765_v48 }
 0xd3e   : > { %v2898_v49 = vpop.f32.mrf.mxu0 }
 0xd3f   : > { %v1831_v56 = vadd.f32 %v2898_v49, %v3896_v24  ;;  %v2677_v49 = vld [vmem:[%s4326_s28] ss:$0 sm:$0xff] }
 0xd40   : > { %v1822_v51 = vpop.f32.mrf.mxu0 }
 0xd41   : > { %v1823_v52 = vadd.f32 %v1822_v51, %v4049_v50 }
 0xd42   : > { %v2899_v53 = vpop.f32.mrf.mxu0 }
 0xd43   : > { %1839 = vadd.xlane.f32.xlu0 %v1823_v52  ;;  %v1834_v58 = vadd.f32 %v2899_v53, %v3898_v25 }
 0xd44   : > { %v1825_v55 = vpop.f32.mrf.mxu0 }
 0xd45   : > { %v1826_v57 = vadd.f32 %v1825_v55, %v4052_v54 }
 0xd47   : > { %1841 = vadd.xlane.f32.xlu1 %v1826_v57  ;;  %1843 = vadd.xlane.f32.xlu0 %v1831_v56 }
 0xd4b   : > { %1845 = vadd.xlane.f32.xlu0 %v1834_v58 }
 0xdcc   : > { %v1840_v59 = vpop.xlane.xlu0 %1839 }
 0xdcd   : > { %v1847_v60 = vmul.f32 0.03125, %v1840_v59 }
 0xdcf   : > { %v4057_v37 = vsub.f32 %v1823_v52, %v1847_v60  ;;  %v1867_v10 = vmul.f32 %v1847_v60, %v1847_v60 }
 0xdd0   : > { %v1842_v61 = vpop.xlane.xlu1 %1841  ;;  %v1844_v62 = vpop.xlane.xlu0 %1843 }
 0xdd1   : > { %v1848_v63 = vmul.f32 0.03125, %v1842_v61  ;;  %v1849_v0 = vmul.f32 0.03125, %v1844_v62  ;;  %v1855_v1 = vmul.f32 %v4057_v37, %v4057_v37  ;;  %v1871_v13 = vmul.f32 96.0, %v1867_v10 }
 0xdd3   : > { %v4061_v24 = vsub.f32 %v1826_v57, %v1848_v63  ;;  %v4063_v2 = vsub.f32 %v1831_v56, %v1849_v0  ;;  %1859 = vadd.xlane.f32.xlu1 %v1855_v1  ;;  %v1868_v11 = vmul.f32 %v1848_v63, %v1848_v63  ;;  %v1869_v12 = vmul.f32 %v1849_v0, %v1849_v0  ;;  %v2678_v57 = vld [vmem:[%s4327_s5] ss:$0 sm:$0xff] }
 0xdd4   : > { %v1846_v25 = vpop.xlane.xlu0 %1845 }
 0xdd5   : > { %v1850_v3 = vmul.f32 0.03125, %v1846_v25  ;;  %v1856_v4 = vmul.f32 %v4061_v24, %v4061_v24  ;;  %v1857_v5 = vmul.f32 %v4063_v2, %v4063_v2  ;;  %v1873_v18 = vmul.f32 96.0, %v1869_v12  ;;  %v3136_v25 = vld [vmem:[%s3871_s3 + $0x38] sm:$0xff]  }
 0xdd6   : > { %v1872_v19 = vmul.f32 96.0, %v1868_v11  ;;  %2920 = vmatprep.subr.bf16.mxu0 %v3136_v25 }
 0xdd7   : > { %v4069_v6 = vsub.f32 %v1834_v58, %v1850_v3  ;;  %1861 = vadd.xlane.f32.xlu0 %v1856_v4  ;;  %1863 = vadd.xlane.f32.xlu1 %v1857_v5  ;;  %v1870_v16 = vmul.f32 %v1850_v3, %v1850_v3  ;;  %v3137_v3 = vld [vmem:[%s3871_s3 + $0x30] sm:$0xff]   ;;  %v3138_v4 = vld [vmem:[%s3871_s3 + $0x28] sm:$0xff]   ;;  %v3139_v5 = vld [vmem:[%s3871_s3 + $0x20] sm:$0xff]  }
 0xdd8   : > { %2921 = vmatpush3.bf16.msra.mxu0 %v3136_v25 }
 0xdd9   : > { %v1858_v7 = vmul.f32 %v4069_v6, %v4069_v6  ;;  %v1874_v36 = vmul.f32 96.0, %v1870_v16  ;;  %2922 = vmatprep.subr.bf16.mxu0 %v3137_v3 }
 0xddb   : > { %1865 = vadd.xlane.f32.xlu0 %v1858_v7  ;;  %v3140_v7 = vld [vmem:[%s3871_s3 + $0x18] sm:$0xff]  }
 0xddc   : > { %2923 = vmatpush3.bf16.msra.mxu0 %v3137_v3 }
 0xddd   : > { %2924 = vmatprep.subr.bf16.mxu0 %v3138_v4 }
 0xde0   : > { %2925 = vmatpush3.bf16.msra.mxu0 %v3138_v4 }
 0xde1   : > { %2926 = vmatprep.subr.bf16.mxu0 %v3139_v5 }
 0xde4   : > { %2927 = vmatpush3.bf16.msra.mxu0 %v3139_v5 }
 0xde5   : > { %2928 = vmatprep.subr.bf16.mxu0 %v3140_v7 }
 0xde8   : > { %2929 = vmatpush3.bf16.msra.mxu0 %v3140_v7 }
 0xde9   : > { %2930 = vmatprep.subr.bf16.mxu0 %v3141_v8 }
 0xdec   : > { %2931 = vmatpush3.bf16.msra.mxu0 %v3141_v8 }
 0xded   : > { %2932 = vmatprep.subr.bf16.mxu0 %v3142_v30 }
 0xdf0   : > { %2933 = vmatpush3.bf16.msra.mxu0 %v3142_v30 }
 0xdf1   : > { %2934 = vmatprep.subr.bf16.mxu0 %v3143_v31 }
 0xdf4   : > { %2935 = vmatpush3.bf16.msra.mxu0 %v3143_v31 }
 0xe5c   : > { %v1860_v14 = vpop.xlane.xlu1 %1859 }
 0xe5d   : > { %v1875_v15 = vsub.f32 %v1860_v14, %v1871_v13 }
 0xe5f   : > { %v1879_v17 = vmax.f32 %v1875_v15, 0.0 }
 0xe60   : > { %v1864_v20 = vpop.xlane.xlu1 %1863  ;;  %v1862_v21 = vpop.xlane.xlu0 %1861 }
 0xe61   : > { %v1883_v22 = vmul.f32 0.03125, %v1879_v17  ;;  %v1877_v23 = vsub.f32 %v1864_v20, %v1873_v18  ;;  %v1876_v26 = vsub.f32 %v1862_v21, %v1872_v19 }
 0xe63   : > { %v1887_v27 = vadd.f32 1e-05, %v1883_v22  ;;  %v1881_v28 = vmax.f32 %v1877_v23, 0.0  ;;  %v1880_v35 = vmax.f32 %v1876_v26, 0.0 }
 0xe64   : > { %v1866_v38 = vpop.xlane.xlu0 %1865 }
 0xe65   : > { %3208 = vrsqrt.f32 %v1887_v27  ;;  %v1885_v39 = vmul.f32 0.03125, %v1881_v28  ;;  %v1884_v40 = vmul.f32 0.03125, %v1880_v35  ;;  %v1878_v41 = vsub.f32 %v1866_v38, %v1874_v36 }
 0xe67   : > { %v1889_v42 = vadd.f32 1e-05, %v1885_v39  ;;  %v1888_v43 = vadd.f32 1e-05, %v1884_v40  ;;  %v1882_v44 = vmax.f32 %v1878_v41, 0.0 }
 0xe69   : > { %3210 = vrsqrt.f32 %v1889_v42  ;;  %v1886_v45 = vmul.f32 0.03125, %v1882_v44 }
 0xe6a   : > { %3212 = vrsqrt.f32 %v1888_v43 }
 0xe6b   : > { %v1890_v46 = vadd.f32 1e-05, %v1886_v45 }
 0xe6d   : > { %3214 = vrsqrt.f32 %v1890_v46 }
 0xe72   : > { %v3209_v47 = vpop.eup %3208 }
 0xe73   : > { %v1895_v48 = vmul.f32 %v3209_v47, %v4057_v37 }
 0xe75   : > { %v1905_v56 = vmul.f32 %v2677_v49, %v1895_v48 }
 0xe76   : > { %v3211_v51 = vpop.eup %3210 }
 0xe77   : > { %v3213_v52 = vpop.eup %3212  ;;  %v1897_v53 = vmul.f32 %v3211_v51, %v4063_v2  ;;  %v4095_v61 = vadd.f32 %v2678_v57, %v1905_v56 }
 0xe78   : > { %v1896_v55 = vmul.f32 %v3213_v52, %v4061_v24 }
 0xe79   : > { %v1907_v37 = vmul.f32 %v2677_v49, %v1897_v53 }
 0xe7a   : > { %v3215_v58 = vpop.eup %3214  ;;  %v1906_v59 = vmul.f32 %v2677_v49, %v1896_v55 }
 0xe7b   : > { %v1898_v60 = vmul.f32 %v3215_v58, %v4069_v6  ;;  %v4101_v1 = vadd.f32 %v2678_v57, %v1907_v37  ;;  %v865_v6 = vpack.c.bf16 %v4052_v54, %v4049_v50  ;;  %v2679_v50 = vld [vmem:[%s754_s25] ss:$0 sm:$0xff] }
 0xe7c   : > { %v4097_v62 = vadd.f32 %v2678_v57, %v1906_v59 }
 0xe7d   : > { %v1908_v63 = vmul.f32 %v2677_v49, %v1898_v60  ;;  %2824 = vmatprep.mubr.bf16.mxu0 %v865_v6 }
 0xe7e   : > { %v1919_v0 = vpack.c.bf16 %v4097_v62, %v4095_v61 }
 0xe7f   : > { %v4103_v24 = vadd.f32 %v2678_v57, %v1908_v63  ;;  %v2688_v63 = vld [vmem:[%s757_s23] ss:$0 sm:$0xff] }
 0xe80   : > { %2916 = vmatprep.mubr.bf16.mxu1 %v1919_v0 }
 0xe81   : > { %v1920_v2 = vpack.c.bf16 %v4103_v24, %v4101_v1 }
 0xe83   : > { %2917 = vmatmul.mubr.bf16.vlgmr.msra.gmra.mxu1 %v1920_v2 }
 0xf43   : > { %v2918_v54 = vpop.f32.mrf.mxu1 }
 0xf44   : > { %v2035_v32 = vadd.f32 %v2918_v54, %v2679_v50 }
 0xf45   : > { %v2026_v33 = vpop.f32.mrf.mxu1 }
 0xf46   : > { %v2047_v29 = vmul.f32 0.044715, %v2035_v32  ;;  %v2027_v34 = vadd.f32 %v2679_v50, %v2026_v33  ;;  %v2043_v53 = vmul.f32 0.5, %v2035_v32 }
 0xf47   : > { %v2919_v9 = vpop.f32.mrf.mxu1 }
 0xf48   : > { %v2051_v10 = vmul.f32 %v2047_v29, %v2035_v32  ;;  %v2045_v11 = vmul.f32 0.044715, %v2027_v34  ;;  %v2038_v12 = vadd.f32 %v2919_v9, %v2679_v50  ;;  %v2041_v49 = vmul.f32 0.5, %v2027_v34 }
 0xf49   : > { %v2029_v13 = vpop.f32.mrf.mxu1 }
 0xf4a   : > { %v2055_v14 = vmul.f32 %v2051_v10, %v2035_v32  ;;  %v2049_v15 = vmul.f32 %v2045_v11, %v2027_v34  ;;  %v2048_v16 = vmul.f32 0.044715, %v2038_v12  ;;  %v2030_v17 = vadd.f32 %v2679_v50, %v2029_v13 }
 0xf4b   : > { %v2044_v47 = vmul.f32 0.5, %v2038_v12 }
 0xf4c   : > { %v2059_v18 = vadd.f32 %v2055_v14, %v2035_v32  ;;  %v2052_v19 = vmul.f32 %v2048_v16, %v2038_v12  ;;  %v2046_v20 = vmul.f32 0.044715, %v2030_v17  ;;  %v2053_v21 = vmul.f32 %v2049_v15, %v2027_v34 }
 0xf4d   : > { %v2042_v51 = vmul.f32 0.5, %v2030_v17 }
 0xf4e   : > { %v2063_v22 = vmul.f32 0.7978846, %v2059_v18  ;;  %v2056_v23 = vmul.f32 %v2052_v19, %v2038_v12  ;;  %v2050_v26 = vmul.f32 %v2046_v20, %v2030_v17  ;;  %v2057_v27 = vadd.f32 %v2053_v21, %v2027_v34 }
 0xf50   : > { %v2060_v28 = vadd.f32 %v2056_v23, %v2038_v12  ;;  %v2054_v35 = vmul.f32 %v2050_v26, %v2030_v17  ;;  %v2061_v36 = vmul.f32 0.7978846, %v2057_v27  ;;  %3216 = vtanh.f32 %v2063_v22 }
 0xf52   : > { %v2064_v38 = vmul.f32 0.7978846, %v2060_v28  ;;  %v2058_v39 = vadd.f32 %v2054_v35, %v2030_v17  ;;  %3218 = vtanh.f32 %v2061_v36 }
 0xf54   : > { %3220 = vtanh.f32 %v2064_v38  ;;  %v2062_v40 = vmul.f32 0.7978846, %v2058_v39 }
 0xf56   : > { %3222 = vtanh.f32 %v2062_v40 }
 0xf5d   : > { %v3217_v41 = vpop.eup %3216 }
 0xf5e   : > { %v2071_v48 = vadd.f32 1.0, %v3217_v41 }
 0xf5f   : > { %v3219_v42 = vpop.eup %3218 }
 0xf60   : > { %v2069_v44 = vadd.f32 1.0, %v3219_v42  ;;  %v2075_v58 = vmul.f32 %v2071_v48, %v2043_v53 }
 0xf61   : > { %v3221_v43 = vpop.eup %3220 }
 0xf62   : > { %v2072_v45 = vadd.f32 1.0, %v3221_v43  ;;  %v2073_v56 = vmul.f32 %v2069_v44, %v2041_v49 }
 0xf63   : > { %v3223_v46 = vpop.eup %3222 }
 0xf64   : > { %v2070_v52 = vadd.f32 1.0, %v3223_v46  ;;  %v2076_v55 = vmul.f32 %v2072_v45, %v2044_v47 }
 0xf66   : > { %v2074_v57 = vmul.f32 %v2070_v52, %v2042_v51  ;;  %v2078_v60 = vpack.c.bf16 %v2076_v55, %v2075_v58  ;;  %v2697_v55 = vld [vmem:[%s760_s22] ss:$0 sm:$0xff] }
 0xf68   : > { %v2077_v59 = vpack.c.bf16 %v2074_v57, %v2073_v56  ;;  %v2698_v57 = vld [vmem:[%s763_s16] ss:$0 sm:$0xff]  ;;  %s4332_s16 = sld [smem:[#allocation43_spill]] (!%p2699_p0) }
 0xf6a   : > { %2936 = vmatprep.mubr.bf16.mxu0 %v2077_v59 }
 0xf6b   : > { %2937 = vmatmul.mubr.bf16.vlgmr.msra.gmra.mxu0 %v2078_v60 }
0x102b   : > { %v2938_v37 = vpop.f32.mrf.mxu0 }
0x102c   : > { %v2193_v3 = vadd.f32 %v2938_v37, %v2688_v63 }
0x102d   : > { %v2184_v0 = vpop.f32.mrf.mxu0 }
0x102e   : > { %v2185_v2 = vadd.f32 %v2688_v63, %v2184_v0  ;;  %v2201_v30 = vadd.f32 %v2193_v3, %v4101_v1 }
0x102f   : > { %v2939_v25 = vpop.f32.mrf.mxu0 }
0x1030   : > { %v2199_v4 = vadd.f32 %v2185_v2, %v4095_v61  ;;  %v2196_v7 = vadd.f32 %v2939_v25, %v2688_v63 }
0x1031   : > { %v2187_v5 = vpop.f32.mrf.mxu0 }
0x1032   : > { %v2188_v6 = vadd.f32 %v2688_v63, %v2187_v5  ;;  %2205 = vadd.xlane.f32.xlu1 %v2199_v4  ;;  %v2202_v31 = vadd.f32 %v2196_v7, %v4103_v24 }
0x1034   : > { %v2200_v8 = vadd.f32 %v2188_v6, %v4097_v62 }
0x1036   : > { %2207 = vadd.xlane.f32.xlu0 %v2200_v8  ;;  %2209 = vadd.xlane.f32.xlu1 %v2201_v30 }
0x103a   : > { %2211 = vadd.xlane.f32.xlu0 %v2202_v31 }
0x10bb   : > { %v2206_v50 = vpop.xlane.xlu1 %2205 }
0x10bc   : > { %v2213_v54 = vmul.f32 0.03125, %v2206_v50 }
0x10be   : > { %v2217_v32 = vsub.f32 %v2199_v4, %v2213_v54  ;;  %v2233_v15 = vmul.f32 %v2213_v54, %v2213_v54 }
0x10bf   : > { %v2208_v33 = vpop.xlane.xlu0 %2207  ;;  %v2210_v29 = vpop.xlane.xlu1 %2209 }
0x10c0   : > { %v2214_v34 = vmul.f32 0.03125, %v2208_v33  ;;  %v2215_v61 = vmul.f32 0.03125, %v2210_v29  ;;  %v2221_v9 = vmul.f32 %v2217_v32, %v2217_v32  ;;  %v2237_v18 = vmul.f32 96.0, %v2233_v15 }
0x10c2   : > { %v2218_v10 = vsub.f32 %v2200_v8, %v2214_v34  ;;  %v2219_v11 = vsub.f32 %v2201_v30, %v2215_v61  ;;  %2225 = vadd.xlane.f32.xlu1 %v2221_v9  ;;  %v2234_v16 = vmul.f32 %v2214_v34, %v2214_v34  ;;  %v2235_v17 = vmul.f32 %v2215_v61, %v2215_v61 }
0x10c3   : > { %v2212_v12 = vpop.xlane.xlu0 %2211 }
0x10c4   : > { %v2216_v62 = vmul.f32 0.03125, %v2212_v12  ;;  %v2222_v13 = vmul.f32 %v2218_v10, %v2218_v10  ;;  %v2223_v1 = vmul.f32 %v2219_v11, %v2219_v11  ;;  %v2238_v23 = vmul.f32 96.0, %v2234_v16 }
0x10c5   : > { %v2239_v26 = vmul.f32 96.0, %v2235_v17 }
0x10c6   : > { %v2220_v14 = vsub.f32 %v2202_v31, %v2216_v62  ;;  %2227 = vadd.xlane.f32.xlu0 %v2222_v13  ;;  %2229 = vadd.xlane.f32.xlu1 %v2223_v1  ;;  %v2236_v21 = vmul.f32 %v2216_v62, %v2216_v62 }
0x10c8   : > { %v2224_v24 = vmul.f32 %v2220_v14, %v2220_v14  ;;  %v2240_v42 = vmul.f32 96.0, %v2236_v21 }
0x10ca   : > { %2231 = vadd.xlane.f32.xlu0 %v2224_v24 }
0x114b   : > { %v2226_v19 = vpop.xlane.xlu1 %2225 }
0x114c   : > { %v2241_v20 = vsub.f32 %v2226_v19, %v2237_v18 }
0x114e   : > { %v2245_v22 = vmax.f32 %v2241_v20, 0.0 }
0x114f   : > { %v2228_v27 = vpop.xlane.xlu0 %2227  ;;  %v2230_v28 = vpop.xlane.xlu1 %2229 }
0x1150   : > { %v2249_v35 = vmul.f32 0.03125, %v2245_v22  ;;  %v2242_v36 = vsub.f32 %v2228_v27, %v2238_v23  ;;  %v2243_v38 = vsub.f32 %v2230_v28, %v2239_v26 }
0x1152   : > { %v2253_v39 = vadd.f32 1e-05, %v2249_v35  ;;  %v2246_v40 = vmax.f32 %v2242_v36, 0.0  ;;  %v2247_v41 = vmax.f32 %v2243_v38, 0.0 }
0x1153   : > { %v2232_v43 = vpop.xlane.xlu0 %2231 }
0x1154   : > { %3224 = vrsqrt.f32 %v2253_v39  ;;  %v2250_v44 = vmul.f32 0.03125, %v2246_v40  ;;  %v2251_v45 = vmul.f32 0.03125, %v2247_v41  ;;  %v2244_v46 = vsub.f32 %v2232_v43, %v2240_v42 }
0x1156   : > { %v2254_v47 = vadd.f32 1e-05, %v2250_v44  ;;  %v2255_v48 = vadd.f32 1e-05, %v2251_v45  ;;  %v2248_v49 = vmax.f32 %v2244_v46, 0.0 }
0x1158   : > { %3226 = vrsqrt.f32 %v2254_v47  ;;  %v2252_v51 = vmul.f32 0.03125, %v2248_v49 }
0x1159   : > { %3228 = vrsqrt.f32 %v2255_v48 }
0x115a   : > { %v2256_v52 = vadd.f32 1e-05, %v2252_v51 }
0x115c   : > { %3230 = vrsqrt.f32 %v2256_v52 }
0x1161   : > { %v3225_v53 = vpop.eup %3224 }
0x1162   : > { %v2261_v56 = vmul.f32 %v3225_v53, %v2217_v32 }
0x1164   : > { %v2271_v58 = vmul.f32 %v2697_v55, %v2261_v56 }
0x1165   : > { %v3227_v59 = vpop.eup %3226 }
0x1166   : > { %v3229_v60 = vpop.eup %3228  ;;  %v2281_v37 = vadd.f32 %v2698_v57, %v2271_v58  ;;  %v2262_v63 = vmul.f32 %v3227_v59, %v2218_v10 }
0x1167   : > { %v2263_v0 = vmul.f32 %v3229_v60, %v2219_v11 }
0x1168   : > { %2285 = vst [vmem:[#allocation2 + $0x10] sm:$0xff] %v2281_v37  ;;  %v2272_v2 = vmul.f32 %v2697_v55, %v2262_v63 }
0x1169   : > { %v3231_v25 = vpop.eup %3230  ;;  %v2273_v3 = vmul.f32 %v2697_v55, %v2263_v0 }
0x116a   : > { %v2282_v4 = vadd.f32 %v2698_v57, %v2272_v2  ;;  %v2264_v5 = vmul.f32 %v3231_v25, %v2220_v14 }
0x116b   : > { %v2283_v6 = vadd.f32 %v2698_v57, %v2273_v3 }
0x116c   : > { %2286 = vst [vmem:[#allocation2] sm:$0xff] %v2282_v4  ;;  %v2274_v7 = vmul.f32 %v2697_v55, %v2264_v5  ;;  %2292 = sbr.rel (%p2699_p0) target bundleno = 4697 (0x1259), region = 108 }
0x116d   : > { %2287 = vst [vmem:[#allocation2 + $0x18] sm:$0xff] %v2283_v6 }
0x116e   : > { %v2284_v8 = vadd.f32 %v2698_v57, %v2274_v7 }
0x1170   : > { %2288 = vst [vmem:[#allocation2 + $0x8] sm:$0xff] %v2284_v8 }
0x1171   : > { %v3232_v30 = vld [vmem:[%s4332_s16 + $0x38] sm:$0xff]   ;;  %v3504_v31 = vmov 0.0   ;;  %v3233_v50 = vld [vmem:[%s4332_s16 + $0x30] sm:$0xff]   ;;  %vm3505_vm7 = vmmov 0   ;;  %v3234_v54 = vld [vmem:[%s4332_s16 + $0x28] sm:$0xff]   ;;  %v2293_v9 = vpack.c.bf16 %v2283_v6, %v2283_v6 }
0x1172   : > { %2940 = vmatprep.subr.bf16.mxu0 %v3504_v31  ;;  %2956 = vmatprep.mubr.msk.bf16.mxu0 %vm3505_vm7, %v3504_v31  ;;  %v3235_v32 = vld [vmem:[%s4332_s16 + $0x20] sm:$0xff]   ;;  %v3236_v33 = vld [vmem:[%s4332_s16 + $0x18] sm:$0xff]   ;;  %v3237_v29 = vld [vmem:[%s4332_s16 + $0x10] sm:$0xff]  }
0x1173   : > { %2941 = vmatpush3.bf16.msra.mxu0 %v3232_v30  ;;  %v3238_v34 = vld [vmem:[%s4332_s16 + $0x8] sm:$0xff]   ;;  %v3239_v61 = vld [vmem:[%s4332_s16] sm:$0xff]  }
0x1174   : > { %2942 = vmatprep.subr.bf16.mxu0 %v3504_v31  ;;  %v2310_v10 = vld [vmem:[%s4333_s2] sm:$0x1] }
0x1177   : > { %2943 = vmatpush3.bf16.msra.mxu0 %v3233_v50 }
0x1178   : > { %2944 = vmatprep.subr.bf16.mxu0 %v3504_v31 }
0x117b   : > { %2945 = vmatpush3.bf16.msra.mxu0 %v3234_v54 }
0x117c   : > { %2946 = vmatprep.subr.bf16.mxu0 %v3504_v31 }
0x117f   : > { %2947 = vmatpush3.bf16.msra.mxu0 %v3235_v32 }
0x1180   : > { %2948 = vmatprep.subr.bf16.mxu0 %v3504_v31 }
0x1183   : > { %2949 = vmatpush3.bf16.msra.mxu0 %v3236_v33 }
0x1184   : > { %2950 = vmatprep.subr.bf16.mxu0 %v3504_v31 }
0x1187   : > { %2951 = vmatpush3.bf16.msra.mxu0 %v3237_v29 }
0x1188   : > { %2952 = vmatprep.subr.bf16.mxu0 %v3504_v31 }
0x118b   : > { %2953 = vmatpush3.bf16.msra.mxu0 %v3238_v34 }
0x118c   : > { %2954 = vmatprep.subr.bf16.mxu0 %v3504_v31 }
0x118f   : > { %2955 = vmatpush3.bf16.msra.mxu0 %v3239_v61 }
0x1192   : > { %2957 = vmatmul.mubr.bf16.vlgmr.msra.gmra.mxu0 %v2293_v9 }
0x1252   : > { %v2393_v11 = vpop.f32.mrf.mxu0 }
0x1253   : > { %v2394_v12 = vadd.f32 %v2393_v11, %v2310_v10 }
0x1254   : > { %v2958_v62 = vpop.f32.mrf.mxu0 }
0x1255   : > { %2399 = vst [vmem:[%s735_s17] sm:$0x1] %v2394_v12 }
0x1256   : > { %v2396_v13 = vpop.f32.mrf.mxu0 }
0x1258   : > { %v2959_v1 = vpop.f32.mrf.mxu0 }
0x1259 PF: > { %s4334_s23 = sld [smem:[#allocation21_spill]]  ;;  %s2413_s14 = sshll.u32 %s735_s17, 4  ;;  %s2414_s14 = int_to_ptr.vmem [resolvable:$true] %s2413_s14 }
0x125a   : > { %s4336_s1 = sld [smem:[#allocation45_spill]]  ;;  %s2401_s30 = scalar_lea.sflag [#allocation6], %s3811_s10 }
0x125b   : > { %s3350_s19 = scalar_lea.vmem %s2414_s14, 16  ;;  %s3506_s11 = smov [#allocation11]  }
0x125c   : > { %p3351_p5 = scmp.ne.s32.totalorder %s2414_s14, %s3350_s19  ;;  %s3354_s20 = sshll.u32 %s3506_s11, 4  ;;  %s3355_s20 = int_to_ptr.vmem [resolvable:$false] %s3354_s20 }
0x125d   : > { %s3356_s27 = scalar_lea.vmem %s3355_s20, 32  ;;  %p3357_p3 = scmp.lt.s32.totalorder %s2414_s14, %s3355_s20 }
0x125e   : > { %p3352_p7 = pnand %p3351_p5, %p3754_p2  ;;  %p3358_p4 = scmp.lt.s32.totalorder %s3356_s27, %s3350_s19 }
0x125f   : > { %s2708_s8 = sshll.u32 %s4334_s23, 4 }
0x1260   : > { %s2411_s22 = scalar_lea.hbm %s4336_s1, %s2708_s8  ;;  %p3353_p9 = pneg %p3352_p7 }
0x1261   : > { %p3359_p12 = por %p3358_p4, %p3357_p3 }
0x1263   : > { %p3360_p13 = pnand %p3359_p12, %p3353_p9 }
0x1265   : > { %3363 = shalt.err (!%p3360_p13)
}
0x1266   : > { %s3364_s18 = scalar_lea.hbm %s2411_s22, 16  ;;  %s3368_s24 = scalar_lea.hbm %s4336_s1, 32 }
0x1267   : > { %p3365_p6 = scmp.ne.s32.totalorder %s2411_s22, %s3364_s18  ;;  %p3369_p10 = scmp.lt.s32.totalorder %s2411_s22, %s4336_s1 }
0x1268   : > { %p3370_p11 = scmp.lt.s32.totalorder %s3368_s24, %s3364_s18 }
0x1269   : > { %p3366_p1 = pnand %p3365_p6, %p3754_p2 }
0x126a   : > { %p3371_p0 = por %p3370_p11, %p3369_p10 }
0x126b   : > { %p3367_p8 = pneg %p3366_p1 }
0x126d   : > { %p3372_p5 = pnand %p3371_p0, %p3367_p8 }
0x126f   : > { %3375 = shalt.err (!%p3372_p5)
}
0x1270   : > { %2978 = dma.vmem_to_hbm [thread:$0]  (%p3754_p2), %s2414_s14, 16, %s2411_s22, %s2401_s30  }
0x1271 PF: > { %s4337_s15 = sld [smem:[#allocation24_spill]] }
0x1272   : > { %s4338_s5 = sld [smem:[#allocation18_spill]] }
0x1273   : > { %s4339_s26 = sld [smem:[#allocation30_spill]] }
0x1277   : > { %p3001_p7 = scmp.ge.s32.totalorder %s4337_s15, 2 }
0x1278   : > { %s2425_s12 = sand.u32 1, %s4338_s5  }
0x1279   : > { %p4340_p9 = scmp.ne.s32.totalorder %s4339_s26, 0  ;;  %s2426_s21 = scalar_lea.sflag [#allocation6], %s2425_s12 }
0x127b   : > { %p2995_p3 = pnand %p3001_p7, %p4340_p9 }
0x127d   : > { %p2996_p4 = pneg %p2995_p3 }
0x127f   : > { %3433 = dma.done.wait (%p2996_p4), %s2426_s21, 16  }
0x1280   : > { %3435 = vsyncadd (%p2996_p4), %s2426_s21, 4294967280  ;;  %s33_s0 = sadd.s32 1, %s4337_s15   ;;  %s4341_s21 = sld [smem:[#allocation16_spill]] }
0x1281   : > { %p30_p12 = scmp.ge.s32.totalorder %s33_s0, 6   ;;  %s4342_s22 = sld [smem:[#allocation17_spill]] }
0x1282   : > { %s4343_s23 = sld [smem:[#allocation27_spill]] }
0x1283   : > { %s4344_s24 = sld [smem:[#allocation19_spill]] }
0x1284   : > { %s4345_s25 = sld [smem:[#allocation20_spill]] }
0x1285   : > { %s4346_s26 = sld [smem:[#allocation28_spill]]  ;;  %32 = sbr.rel (!%p30_p12) target bundleno = 26 (0x1a), region = 187 }
0x1286   : > { %s4347_s27 = sld [smem:[#allocation22_spill]] }
0x1287   : > { %s4348_s28 = sld [smem:[#allocation23_spill]] }
0x1288   : > { %s4349_s29 = sld [smem:[#allocation25_spill]] }
0x1289   : > { %s4350_s30 = sld [smem:[#allocation26_spill]] }
0x128a   :  { %2430 = vsyncpa [#allocation5], 1 }
0x128b   :  { %2432 = vsyncpa [#allocation5 + $0x1], 1 }
0x128c   :  { %2433 = vsyncpa [#allocation8], 1 }
0x128d   :  { %2434 = vsyncpa [#allocation6], 1 }
0x128e   :  { %2436 = vsyncpa [#allocation6 + $0x1], 1 }

</bundles_post_ra>
